<compile_context>
chip_gen: v5e
topology: v5e:2x2
jax: 0.10.0
libtpu: 0.0.40
codegen_flags: <defaults>
</compile_context>

<pallas_src>
import functools

import jax
import jax.numpy as jnp
from jax.experimental import pallas as pl
from jax.experimental.pallas import tpu as pltpu


def _round_up(x: int, m: int) -> int:
    return ((x + m - 1) // m) * m


def label_predictor_kernel(x_ref, w1_ref, b1_ref, w2_ref, b2_ref, out_ref):
    # fc1 + ReLU (MXU matmul, f32 accumulate)
    h = jnp.dot(x_ref[...], w1_ref[...], preferred_element_type=jnp.float32)
    h = jnp.maximum(h + b1_ref[...], 0.0)          # b1 is (1, H) -> broadcasts

    # fc2 (padded class dim -> lane-dense logits)
    logits = jnp.dot(h, w2_ref[...], preferred_element_type=jnp.float32)
    logits = logits + b2_ref[...]                   # padded classes get -inf bias

    # numerically stable softmax over the (padded) class dim; padded columns
    # contribute exp(-inf) == 0 exactly, so real-class probabilities are unchanged.
    m = jnp.max(logits, axis=-1, keepdims=True)
    e = jnp.exp(logits - m)
    denom = jnp.sum(e, axis=-1, keepdims=True)
    out_ref[...] = (e * pl.reciprocal(denom, approx=True)).astype(out_ref.dtype)


@functools.partial(jax.jit, static_argnames=("tm",))
def label_predictor(x, w1, b1, w2, b2, *, tm: int = 512):
    """softmax(relu(x @ w1 + b1) @ w2 + b2, axis=1) via a batch-tiled Pallas kernel.

    x : [batch, input_size]   float32
    w1: [input_size, hidden]  b1: [hidden]
    w2: [hidden, num_classes] b2: [num_classes]
    """
    batch, in_features = x.shape
    hidden = w1.shape[1]
    num_classes = w2.shape[1]

    # --- lane-dense class padding (pad classes to a multiple of 128) ----------
    c_pad = max(128, _round_up(num_classes, 128))
    w2_p = jnp.zeros((hidden, c_pad), jnp.float32).at[:, :num_classes].set(w2)
    b2_p = jnp.full((1, c_pad), -jnp.inf, jnp.float32).at[:, :num_classes].set(
        b2.reshape(1, num_classes)
    )
    b1_p = b1.reshape(1, hidden).astype(jnp.float32)

    # --- batch tiling ----------------------------------------------------------
    tm = min(tm, _round_up(batch, 8))          # don't blow tiny batches up to 512
    batch_p = _round_up(batch, tm)
    if batch_p != batch:
        x = jnp.pad(x, ((0, batch_p - batch), (0, 0)))
    grid = (batch_p // tm,)

    # --- VMEM budget (double-buffered tiles + resident weights), f32 = 4B ------
    need = 4 * (
        2 * tm * in_features            # x tile, double buffered
        + 2 * tm * c_pad                # out tile, double buffered
        + 2 * (in_features * hidden + hidden + hidden * c_pad + c_pad)  # weights/biases
    )
    vmem_limit = int(min(max(2 * need, 16 * 1024 * 1024), 48 * 1024 * 1024))

    out = pl.pallas_call(
        label_predictor_kernel,
        out_shape=jax.ShapeDtypeStruct((batch_p, c_pad), jnp.float32),
        grid=grid,
        in_specs=[
            pl.BlockSpec((tm, in_features), lambda i: (i, 0)),     # x: walks batch
            pl.BlockSpec((in_features, hidden), lambda i: (0, 0)),  # W1: resident
            pl.BlockSpec((1, hidden), lambda i: (0, 0)),            # b1: resident
            pl.BlockSpec((hidden, c_pad), lambda i: (0, 0)),        # W2: resident
            pl.BlockSpec((1, c_pad), lambda i: (0, 0)),             # b2: resident
        ],
        out_specs=pl.BlockSpec((tm, c_pad), lambda i: (i, 0)),
        compiler_params=pltpu.CompilerParams(
            dimension_semantics=("parallel",),   # shard batch tiles across TCs (v7x)
            vmem_limit_bytes=vmem_limit,
        ),
    )(x, w1.astype(jnp.float32), b1_p, w2_p, b2_p)

    return out[:batch, :num_classes]


def init_params(key, input_size, hidden_size, num_classes):
    """Deterministic synthetic init matching nn.Linear shapes (weights stored [in, out])."""
    k1, k2, k3, k4 = jax.random.split(key, 4)
    bound1 = 1.0 / jnp.sqrt(input_size)
    bound2 = 1.0 / jnp.sqrt(hidden_size)
    w1 = jax.random.uniform(k1, (input_size, hidden_size), jnp.float32, -bound1, bound1)
    b1 = jax.random.uniform(k2, (hidden_size,), jnp.float32, -bound1, bound1)
    w2 = jax.random.uniform(k3, (hidden_size, num_classes), jnp.float32, -bound2, bound2)
    b2 = jax.random.uniform(k4, (num_classes,), jnp.float32, -bound2, bound2)
    return w1, b1, w2, b2


if __name__ == "__main__":
    # Module-consistent dims (hidden_size=128, num_classes=2); MXU/lane-friendly
    # input width and a batch large enough to exercise >1 grid step.
    batch = 1024
    input_size = 256
    hidden_size = 128
    num_classes = 2

    key = jax.random.PRNGKey(0)
    kx, kp = jax.random.split(key)
    x = jax.random.normal(kx, (batch, input_size), jnp.float32)
    w1, b1, w2, b2 = init_params(kp, input_size, hidden_size, num_classes)

    out = label_predictor(x, w1, b1, w2, b2, tm=512)
    out = jax.block_until_ready(out)

    # Sanity check against a plain-JAX reference (tolerance loosened slightly
    # for the EUP approx reciprocal in the softmax denominator).
    h_ref = jnp.maximum(x @ w1 + b1[None, :], 0.0)
    ref = jax.nn.softmax(h_ref @ w2 + b2[None, :], axis=1)
    assert out.shape == (batch, num_classes)
    assert bool(jnp.all(jnp.isfinite(out)))
    assert jnp.allclose(out, ref, atol=2e-3, rtol=2e-3)

    print("KERNEL_OK")
</pallas_src>

<mosaic_0001>
module attributes {stable_mosaic.version = 11 : i64} {
  func.func @label_predictor_kernel(%arg0: i32, %arg1: memref<512x256xf32, #tpu.memory_space<vmem>>, %arg2: memref<256x128xf32, #tpu.memory_space<vmem>>, %arg3: memref<1x128xf32, #tpu.memory_space<vmem>>, %arg4: memref<128x128xf32, #tpu.memory_space<vmem>>, %arg5: memref<1x128xf32, #tpu.memory_space<vmem>>, %arg6: memref<512x128xf32, #tpu.memory_space<vmem>>) attributes {dimension_semantics = [#tpu.dimension_semantics<parallel>], iteration_bounds = array<i64: 2>, scalar_prefetch = 0 : i64, scratch_operands = 0 : i64, tpu.core_type = #tpu.core_type<tc>, window_params = [{transform_indices = @transform_0, window_bounds = array<i64: 512, 256>}, {pipeline_mode = #tpu.pipeline_mode<synchronous>, transform_indices = @transform_1, window_bounds = array<i64: 256, 128>}, {pipeline_mode = #tpu.pipeline_mode<synchronous>, transform_indices = @transform_2, window_bounds = array<i64: 1, 128>}, {pipeline_mode = #tpu.pipeline_mode<synchronous>, transform_indices = @transform_3, window_bounds = array<i64: 128, 128>}, {pipeline_mode = #tpu.pipeline_mode<synchronous>, transform_indices = @transform_4, window_bounds = array<i64: 1, 128>}, {transform_indices = @transform_5, window_bounds = array<i64: 512, 128>}]} {
    %c0 = arith.constant 0 : index
    %c0_0 = arith.constant 0 : index
    %0 = vector.load %arg1[%c0, %c0_0] : memref<512x256xf32, #tpu.memory_space<vmem>>, vector<512x256xf32>
    %c0_1 = arith.constant 0 : index
    %c0_2 = arith.constant 0 : index
    %1 = vector.load %arg2[%c0_1, %c0_2] : memref<256x128xf32, #tpu.memory_space<vmem>>, vector<256x128xf32>
    %cst = arith.constant dense<0.000000e+00> : vector<512x128xf32>
    %2 = tpu.matmul %0, %1, %cst {dimension_numbers = #tpu.dot_dimension_numbers<[1], [0], [0], [1], [0, 0, 1, 1], [], []>} : vector<512x256xf32>, vector<256x128xf32>, vector<512x128xf32> -> vector<512x128xf32>
    %c0_3 = arith.constant 0 : index
    %c0_4 = arith.constant 0 : index
    %3 = vector.load %arg3[%c0_3, %c0_4] : memref<1x128xf32, #tpu.memory_space<vmem>>, vector<1x128xf32>
    %4 = vector.broadcast %3 : vector<1x128xf32> to vector<512x128xf32>
    %5 = arith.addf %2, %4 : vector<512x128xf32>
    %cst_5 = arith.constant 0.000000e+00 : f32
    %6 = vector.broadcast %cst_5 : f32 to vector<512x128xf32>
    %7 = arith.maximumf %5, %6 : vector<512x128xf32>
    %c0_6 = arith.constant 0 : index
    %c0_7 = arith.constant 0 : index
    %8 = vector.load %arg4[%c0_6, %c0_7] : memref<128x128xf32, #tpu.memory_space<vmem>>, vector<128x128xf32>
    %cst_8 = arith.constant dense<0.000000e+00> : vector<512x128xf32>
    %9 = tpu.matmul %7, %8, %cst_8 {dimension_numbers = #tpu.dot_dimension_numbers<[1], [0], [0], [1], [0, 0, 1, 1], [], []>} : vector<512x128xf32>, vector<128x128xf32>, vector<512x128xf32> -> vector<512x128xf32>
    %c0_9 = arith.constant 0 : index
    %c0_10 = arith.constant 0 : index
    %10 = vector.load %arg5[%c0_9, %c0_10] : memref<1x128xf32, #tpu.memory_space<vmem>>, vector<1x128xf32>
    %11 = vector.broadcast %10 : vector<1x128xf32> to vector<512x128xf32>
    %12 = arith.addf %9, %11 : vector<512x128xf32>
    %cst_11 = arith.constant dense<0xFF800000> : vector<512xf32>
    %13 = vector.multi_reduction <maximumf>, %12, %cst_11 [1] : vector<512x128xf32> to vector<512xf32>
    %14 = vector.shape_cast %13 : vector<512xf32> to vector<512x1xf32>
    %15 = vector.broadcast %14 : vector<512x1xf32> to vector<512x128xf32>
    %16 = arith.subf %12, %15 : vector<512x128xf32>
    %17 = math.exp %16 : vector<512x128xf32>
    %cst_12 = arith.constant dense<0.000000e+00> : vector<512xf32>
    %18 = vector.multi_reduction <add>, %17, %cst_12 [1] : vector<512x128xf32> to vector<512xf32>
    %19 = vector.shape_cast %18 : vector<512xf32> to vector<512x1xf32>
    %20 = tpu.reciprocal %19 {approx = true} : vector<512x1xf32> -> vector<512x1xf32>
    %21 = vector.broadcast %20 : vector<512x1xf32> to vector<512x128xf32>
    %22 = arith.mulf %17, %21 : vector<512x128xf32>
    %c0_13 = arith.constant 0 : index
    %c0_14 = arith.constant 0 : index
    %23 = vector.load %arg6[%c0_13, %c0_14] : memref<512x128xf32, #tpu.memory_space<vmem>>, vector<512x128xf32>
    tpu.vector_store %arg6[%c0_13, %c0_14], %22 {strides = array<i32>} : memref<512x128xf32, #tpu.memory_space<vmem>>, vector<512x128xf32>,
    return
  }
  func.func @transform_0(%arg0: i32) -> (i32, i32) {
    %c0_i32 = arith.constant 0 : i32
    %c0_i32_0 = arith.constant 0 : i32
    return %arg0, %c0_i32 : i32, i32
  }
  func.func @transform_1(%arg0: i32) -> (i32, i32) {
    %c0_i32 = arith.constant 0 : i32
    %c0_i32_0 = arith.constant 0 : i32
    %c0_i32_1 = arith.constant 0 : i32
    return %c0_i32, %c0_i32_0 : i32, i32
  }
  func.func @transform_2(%arg0: i32) -> (i32, i32) {
    %c0_i32 = arith.constant 0 : i32
    %c0_i32_0 = arith.constant 0 : i32
    %c0_i32_1 = arith.constant 0 : i32
    return %c0_i32, %c0_i32_0 : i32, i32
  }
  func.func @transform_3(%arg0: i32) -> (i32, i32) {
    %c0_i32 = arith.constant 0 : i32
    %c0_i32_0 = arith.constant 0 : i32
    %c0_i32_1 = arith.constant 0 : i32
    return %c0_i32, %c0_i32_0 : i32, i32
  }
  func.func @transform_4(%arg0: i32) -> (i32, i32) {
    %c0_i32 = arith.constant 0 : i32
    %c0_i32_0 = arith.constant 0 : i32
    %c0_i32_1 = arith.constant 0 : i32
    return %c0_i32, %c0_i32_0 : i32, i32
  }
  func.func @transform_5(%arg0: i32) -> (i32, i32) {
    %c0_i32 = arith.constant 0 : i32
    %c0_i32_0 = arith.constant 0 : i32
    return %arg0, %c0_i32 : i32, i32
  }
}

</mosaic_0001>

<bundles_post_ra>
// kernel: label_predictor.1
= control target key start
LH: loop header
LB: loop body
LE: loop exit
PB: predicated region body
PF: predicated region fallthrough
CT: control target
= control target key end

     0   :  { %10 = vsyncpa [#allocation3], 0  ;;  %s3482_s0 = inlined_call_operand.hbm [shape: f32[1024,256], index: 0, kind: input, shape index: {}]   ;;  %s3483_s1 = inlined_call_operand.vmem [shape: f32[256,128], index: 1, kind: input, shape index: {}]   ;;  %s3484_s2 = inlined_call_operand.vmem [shape: f32[1,128], index: 2, kind: input, shape index: {}]   ;;  %s3485_s3 = inlined_call_operand.vmem [shape: f32[128,128], index: 3, kind: input, shape index: {}]   ;;  %s3486_s4 = inlined_call_operand.vmem [shape: f32[1,128], index: 4, kind: input, shape index: {}]   ;;  %s3487_s5 = inlined_call_operand.vmem [shape: f32[1024,128], index: 5, kind: output, shape index: {}]  }
   0x1   :  { %12 = vsyncpa [#allocation3 + $0x1], 0  ;;  %s2295_s18 = smov 0   ;;  %s2297_s19 = smov 0  }
   0x2   :  { %s2299_s20 = smov 0   ;;  %s2301_s21 = smov 0  }
   0x3 LB: > { %s1832_s22 = sadd.s32 4294967295, %s2261_s21   ;;  %s2315_s23 = sadd.s32 1, %s2261_s21   ;;  %s2261_s21 = sphi %s2301_s21, %s3494_s21   ;;  %s2257_s20 = sphi %s2299_s20, %s3493_s20   ;;  %s2253_s19 = sphi %s2297_s19, %s3492_s19   ;;  %s2249_s18 = sphi %s2295_s18, %s3491_s18  }
   0x4   : > { %s22_s24 = ssub.s32 %s2261_s21, %s2315_s23  ;;  %s25_s25 = sadd.s32 1, %s2257_s20 }
   0x5   : > { %p23_p0 = scmp.eq.s32.totalorder %s22_s24, 0  ;;  %p32_p1 = scmp.ne.s32.totalorder %s2257_s20, %s2253_s19 }
   0x6   : > { %p33_p2 = scmp.eq.s32.totalorder %s2261_s21, 0  ;;  %p38_p3 = scmp.ne.s32.totalorder %s2253_s19, %s2249_s18 }
   0x7   : > { %s2325_s26 = scalar_select %p23_p0, %s2257_s20, %s25_s25  }
   0x8   : > { %p2327_p4 = por %p33_p2, %p32_p1  ;;  %p39_p5 = scmp.eq.s32.totalorder %s1832_s22, 0 }
   0x9   : > { %p1902_p6 = scmp.lt.s32.totalorder %s2261_s21, 2  ;;  %s184_s29 = sand.u32 1, %s2257_s20  }
   0xa   : > { %p2334_p7 = por %p39_p5, %p38_p3  ;;  %s1836_s30 = sshll.u32 %s184_s29, 10 }
   0xb   : > { %s1847_s6 = sshll.u32 %s2261_s21, 10  ;;  %s188_s10 = scalar_lea.vmem [#allocation2], %s1836_s30 }
   0xc   : > { %s194_s9 = scalar_lea.hbm %s3482_s0, %s1847_s6  ;;  %s197_s11 = sshll.u32 %s188_s10, 4  ;;  %s198_s11 = int_to_ptr.vmem [resolvable:$true] %s197_s11 }
   0xd   : > { %s195_s12 = sshll.u32 %s194_s9, 4  ;;  %p2345_p8 = pnand %p1902_p6, %p2327_p4  ;;  %s196_s12 = int_to_ptr.hbm [resolvable:$true] %s195_s12 }
   0xe   : > { %p1840_p9 = scmp.ge.s32.totalorder %s2261_s21, 1  ;;  %s185_s14 = scalar_lea.sflag [#allocation3], %s184_s29 }
   0xf   : > { %s2197_s15 = sshra.s32 %s196_s12, 4  ;;  %p2201_p11 = pneg %p2345_p8  ;;  %s2198_s15 = int_to_ptr.hbm [resolvable:$true] %s2197_s15 }
  0x10   : > { %s2199_s16 = scalar_lea.hbm %s2198_s15, 1024  ;;  %s2204_s24 = scalar_lea.hbm %s3482_s0, 2048 }
  0x11   : > { %p2200_p10 = scmp.ne.s32.totalorder %s2198_s15, %s2199_s16  ;;  %p2205_p0 = scmp.lt.s32.totalorder %s2198_s15, %s3482_s0 }
  0x12   : > { %p2206_p1 = scmp.lt.s32.totalorder %s2204_s24, %s2199_s16 }
  0x13   : > { %p2202_p12 = pnand %p2201_p11, %p2200_p10 }
  0x14   : > { %p2207_p2 = por %p2206_p1, %p2205_p0 }
  0x15   : > { %p2203_p13 = pneg %p2202_p12 }
  0x17   : > { %p2208_p3 = pnand %p2207_p2, %p2203_p13 }
  0x19   : > { %2211 = shalt.err (!%p2208_p3)
}
  0x1a   : > { %s2263_s29 = smov 256   ;;  %s2264_s30 = smov 16  }
  0x1b   : > { %1901 = dma.hbm_to_vmem [thread:$0]  (!%p2345_p8), %s196_s12, 16384, %s198_s11, %s185_s14, %s2263_s29, %s2263_s29, %s2264_s30  }
  0x1c   : > { %p205_p4 = scmp.lt.s32.totalorder %s2261_s21, 3 }
  0x1e   : > { %p206_p5 = pnand %p1840_p9, %p205_p4 }
  0x1f   : > { %s211_s6 = sand.u32 (!%p206_p5), 1, %s2253_s19  }
  0x20   : > { %209 = sbr.rel (%p206_p5) target bundleno = 987 (0x3db), region = 40  ;;  %s1841_s7 = sshll.u32 (!%p206_p5), %s211_s6, 10 }
  0x21   : > { %s212_s8 = scalar_lea.sflag (!%p206_p5), [#allocation3], %s211_s6  ;;  %s2364_s9 = scalar_lea.vmem (!%p206_p5), [#allocation2], %s1841_s7 }
  0x25   : > { %2244 = dma.done.wait (%p2334_p7), %s212_s8, 16384  }
  0x26   : > { %2246 = vsyncadd (%p2334_p7), %s212_s8, 4294950912  ;;  %v393_v0 = vld [vmem:[%s3483_s1 + $0x78] sm:$0xff]  ;;  %v392_v1 = vld [vmem:[%s3483_s1 + $0x70] sm:$0xff]  ;;  %s1842_s29 = sshll.u32 %s1832_s22, 6 }
  0x27   : > { %v2379_v2 = vld [vmem:[%s3483_s1 + $0xf8] sm:$0xff]  ;;  %414 = vmatpush.msra.mxu0 %v393_v0  ;;  %1848 = vmatpush.msra.mxu3 %v393_v0  ;;  %v2384_v3 = vld [vmem:[%s3483_s1 + $0xf0] sm:$0xff]  ;;  %v391_v4 = vld [vmem:[%s3483_s1 + $0x68] sm:$0xff]  ;;  %p245_p6 = scmp.lt.s32.totalorder %s1842_s29, 127 }
  0x28   : > { %623 = vmatpush.msra.mxu1 %v2379_v2  ;;  %v2393_v5 = vld [vmem:[%s3483_s1 + $0xe8] sm:$0xff]  ;;  %v390_v6 = vld [vmem:[%s3483_s1 + $0x60] sm:$0xff]  ;;  %v389_v8 = vld [vmem:[%s3483_s1 + $0x58] sm:$0xff] }
  0x29   : > { %415 = vmatpush.msra.mxu0 %v392_v1  ;;  %1849 = vmatpush.msra.mxu3 %v392_v1  ;;  %v2402_v7 = vld [vmem:[%s3483_s1 + $0xe0] sm:$0xff]  ;;  %v2411_v9 = vld [vmem:[%s3483_s1 + $0xd8] sm:$0xff]  ;;  %v388_v10 = vld [vmem:[%s3483_s1 + $0x50] sm:$0xff]  ;;  %s3496_s29 = smov (!%p245_p6, %s1842_s29), 127 }
  0x2a   : > { %624 = vmatpush.msra.mxu1 %v2384_v3  ;;  %v2420_v11 = vld [vmem:[%s3483_s1 + $0xd0] sm:$0xff]  ;;  %v387_v12 = vld [vmem:[%s3483_s1 + $0x48] sm:$0xff]  ;;  %v386_v14 = vld [vmem:[%s3483_s1 + $0x40] sm:$0xff]  ;;  %s1843_s21 = sshll.u32 %s3496_s29, 3 }
  0x2b   : > { %416 = vmatpush.msra.mxu0 %v391_v4  ;;  %1850 = vmatpush.msra.mxu3 %v391_v4  ;;  %v2429_v13 = vld [vmem:[%s3483_s1 + $0xc8] sm:$0xff]  ;;  %v2438_v15 = vld [vmem:[%s3483_s1 + $0xc0] sm:$0xff]  ;;  %v385_v16 = vld [vmem:[%s3483_s1 + $0x38] sm:$0xff]  ;;  %s3064_s6 = scalar_lea.vmem %s3487_s5, %s1843_s21 }
  0x2c   : > { %625 = vmatpush.msra.mxu1 %v2393_v5  ;;  %v2447_v17 = vld [vmem:[%s3483_s1 + $0xb8] sm:$0xff]  ;;  %v384_v18 = vld [vmem:[%s3483_s1 + $0x30] sm:$0xff]  ;;  %v383_v20 = vld [vmem:[%s3483_s1 + $0x28] sm:$0xff] }
  0x2d   : > { %417 = vmatpush.msra.mxu0 %v390_v6  ;;  %1851 = vmatpush.msra.mxu3 %v390_v6  ;;  %v400_v19 = vld [vmem:[%s3483_s1 + $0xb0] sm:$0xff]  ;;  %v399_v21 = vld [vmem:[%s3483_s1 + $0xa8] sm:$0xff]  ;;  %v382_v22 = vld [vmem:[%s3483_s1 + $0x20] sm:$0xff] }
  0x2e   : > { %626 = vmatpush.msra.mxu1 %v2402_v7  ;;  %v398_v23 = vld [vmem:[%s3483_s1 + $0xa0] sm:$0xff]  ;;  %v381_v24 = vld [vmem:[%s3483_s1 + $0x18] sm:$0xff]  ;;  %v380_v26 = vld [vmem:[%s3483_s1 + $0x10] sm:$0xff] }
  0x2f   : > { %418 = vmatpush.msra.mxu0 %v389_v8  ;;  %1852 = vmatpush.msra.mxu3 %v389_v8  ;;  %v397_v25 = vld [vmem:[%s3483_s1 + $0x98] sm:$0xff]  ;;  %v396_v27 = vld [vmem:[%s3483_s1 + $0x90] sm:$0xff]  ;;  %v379_v28 = vld [vmem:[%s3483_s1 + $0x8] sm:$0xff] }
  0x30   : > { %627 = vmatpush.msra.mxu1 %v2411_v9  ;;  %v395_v29 = vld [vmem:[%s3483_s1 + $0x88] sm:$0xff]  ;;  %v378_v30 = vld [vmem:[%s3483_s1] sm:$0xff]  ;;  %v252_v35 = vld [vmem:[%s2364_s9 + $0x10] sm:$0xff] }
  0x31   : > { %419 = vmatpush.msra.mxu0 %v388_v10  ;;  %1853 = vmatpush.msra.mxu3 %v388_v10  ;;  %v250_v31 = vld [vmem:[%s2364_s9] sm:$0xff]  ;;  %v251_v34 = vld [vmem:[%s2364_s9 + $0x8] sm:$0xff]  ;;  %v348_v36 = vld [vmem:[%s2364_s9 + $0x310] sm:$0xff] }
  0x32   : > { %628 = vmatpush.msra.mxu1 %v2420_v11  ;;  %v346_v32 = vld [vmem:[%s2364_s9 + $0x300] sm:$0xff]  ;;  %v253_v37 = vld [vmem:[%s2364_s9 + $0x18] sm:$0xff]  ;;  %v255_v40 = vld [vmem:[%s2364_s9 + $0x28] sm:$0xff] }
  0x33   : > { %420 = vmatpush.msra.mxu0 %v387_v12  ;;  %1854 = vmatpush.msra.mxu3 %v387_v12  ;;  %v394_v33 = vld [vmem:[%s3483_s1 + $0x80] sm:$0xff]  ;;  %v256_v41 = vld [vmem:[%s2364_s9 + $0x30] sm:$0xff]  ;;  %v257_v43 = vld [vmem:[%s2364_s9 + $0x38] sm:$0xff] }
  0x34   : > { %629 = vmatpush.msra.mxu1 %v2429_v13  ;;  %v254_v38 = vld [vmem:[%s2364_s9 + $0x20] sm:$0xff]  ;;  %v352_v42 = vld [vmem:[%s2364_s9 + $0x330] sm:$0xff]  ;;  %v259_v46 = vld [vmem:[%s2364_s9 + $0x48] sm:$0xff] }
  0x35   : > { %421 = vmatpush.msra.mxu0 %v386_v14  ;;  %1855 = vmatpush.msra.mxu3 %v386_v14  ;;  %v350_v39 = vld [vmem:[%s2364_s9 + $0x320] sm:$0xff]  ;;  %v260_v47 = vld [vmem:[%s2364_s9 + $0x50] sm:$0xff]  ;;  %v261_v49 = vld [vmem:[%s2364_s9 + $0x58] sm:$0xff] }
  0x36   : > { %630 = vmatpush.msra.mxu1 %v2438_v15  ;;  %v258_v44 = vld [vmem:[%s2364_s9 + $0x40] sm:$0xff]  ;;  %v356_v48 = vld [vmem:[%s2364_s9 + $0x350] sm:$0xff]  ;;  %v263_v52 = vld [vmem:[%s2364_s9 + $0x68] sm:$0xff] }
  0x37   : > { %422 = vmatpush.msra.mxu0 %v385_v16  ;;  %1856 = vmatpush.msra.mxu3 %v385_v16  ;;  %v354_v45 = vld [vmem:[%s2364_s9 + $0x340] sm:$0xff]  ;;  %v264_v53 = vld [vmem:[%s2364_s9 + $0x70] sm:$0xff]  ;;  %v265_v55 = vld [vmem:[%s2364_s9 + $0x78] sm:$0xff] }
  0x38   : > { %631 = vmatpush.msra.mxu1 %v2447_v17  ;;  %v262_v50 = vld [vmem:[%s2364_s9 + $0x60] sm:$0xff]  ;;  %v360_v54 = vld [vmem:[%s2364_s9 + $0x370] sm:$0xff]  ;;  %v267_v58 = vld [vmem:[%s2364_s9 + $0x88] sm:$0xff] }
  0x39   : > { %423 = vmatpush.msra.mxu0 %v384_v18  ;;  %1857 = vmatpush.msra.mxu3 %v384_v18  ;;  %v358_v51 = vld [vmem:[%s2364_s9 + $0x360] sm:$0xff]  ;;  %v911_v59 = vld [vmem:[%s3485_s3 + $0x78] sm:$0xff]  ;;  %v910_v60 = vld [vmem:[%s3485_s3 + $0x70] sm:$0xff] }
  0x3a   : > { %632 = vmatpush.msra.mxu1 %v400_v19  ;;  %v266_v56 = vld [vmem:[%s2364_s9 + $0x80] sm:$0xff]  ;;  %916 = vmatpush.msra.mxu2 %v911_v59  ;;  %v268_v61 = vld [vmem:[%s2364_s9 + $0x90] sm:$0xff]  ;;  %v269_v63 = vld [vmem:[%s2364_s9 + $0x98] sm:$0xff] }
  0x3b   : > { %424 = vmatpush.msra.mxu0 %v383_v20  ;;  %1858 = vmatpush.msra.mxu3 %v383_v20  ;;  %v362_v57 = vld [vmem:[%s2364_s9 + $0x380] sm:$0xff]  ;;  %v364_v62 = vld [vmem:[%s2364_s9 + $0x390] sm:$0xff]  ;;  %v909_v0 = vld [vmem:[%s3485_s3 + $0x68] sm:$0xff] }
  0x3c   : > { %633 = vmatpush.msra.mxu1 %v399_v21  ;;  %917 = vmatpush.msra.mxu2 %v910_v60  ;;  %v908_v1 = vld [vmem:[%s3485_s3 + $0x60] sm:$0xff]  ;;  %v271_v6 = vld [vmem:[%s2364_s9 + $0xa8] sm:$0xff]  ;;  %v902_v10 = vld [vmem:[%s3485_s3 + $0x30] sm:$0xff] }
  0x3d   : > { %425 = vmatpush.msra.mxu0 %v382_v22  ;;  %1859 = vmatpush.msra.mxu3 %v382_v22  ;;  %v270_v4 = vld [vmem:[%s2364_s9 + $0xa0] sm:$0xff]  ;;  %v368_v12 = vld [vmem:[%s2364_s9 + $0x3b0] sm:$0xff]  ;;  %v901_v14 = vld [vmem:[%s3485_s3 + $0x28] sm:$0xff] }
  0x3e   : > { %634 = vmatpush.msra.mxu1 %v398_v23  ;;  %918 = vmatpush.msra.mxu2 %v909_v0  ;;  %v904_v8 = vld [vmem:[%s3485_s3 + $0x40] sm:$0xff]  ;;  %v899_v16 = vld [vmem:[%s3485_s3 + $0x18] sm:$0xff]  ;;  %v275_v20 = vld [vmem:[%s2364_s9 + $0xc8] sm:$0xff] }
  0x3f   : > { %426 = vmatpush.msra.mxu0 %v381_v24  ;;  %1860 = vmatpush.msra.mxu3 %v381_v24  ;;  %v370_v18 = vld [vmem:[%s2364_s9 + $0x3c0] sm:$0xff]  ;;  %v372_v24 = vld [vmem:[%s2364_s9 + $0x3d0] sm:$0xff] }
  0x40   : > { %635 = vmatpush.msra.mxu1 %v397_v25  ;;  %919 = vmatpush.msra.mxu2 %v908_v1  ;;  %v896_v22 = vld [vmem:[%s3485_s3] sm:$0xff] }
  0x41   : > { %427 = vmatpush.msra.mxu0 %v380_v26  ;;  %1861 = vmatpush.msra.mxu3 %v380_v26  ;;  %v278_v26 = vld [vmem:[%s2364_s9 + $0xe0] sm:$0xff] }
  0x42   : > { %636 = vmatpush.msra.mxu1 %v396_v27 }
  0x43   : > { %428 = vmatpush.msra.mxu0 %v379_v28  ;;  %1862 = vmatpush.msra.mxu3 %v379_v28  ;;  %v279_v28 = vld [vmem:[%s2364_s9 + $0xe8] sm:$0xff] }
  0x44   : > { %637 = vmatpush.msra.mxu1 %v395_v29 }
  0x45   : > { %429 = vmatpush.msra.mxu0 %v378_v30  ;;  %1863 = vmatpush.msra.mxu3 %v378_v30  ;;  %v376_v30 = vld [vmem:[%s2364_s9 + $0x3f0] sm:$0xff] }
  0x46   : > { %430 = vmatmul.f32.vlgmr.msra.gmra.mxu0 %v250_v31  ;;  %574 = vmatmul.f32.vlgmr.msra.gmra.mxu3 %v346_v32  ;;  %v281_v31 = vld [vmem:[%s2364_s9 + $0xf8] sm:$0xff]  ;;  %v2601_v32 = vld [vmem:[%s3484_s2] ss:$0 sm:$0xff] }
  0x47   : > { %638 = vmatpush.msra.mxu1 %v394_v33  ;;  %1864 = vmatpush.msrb.mxu3 %v2379_v2  ;;  %v907_v2 = vld [vmem:[%s3485_s3 + $0x58] sm:$0xff] }
  0x48   : > { %639 = vmatmul.f32.vlgmr.msra.gmra.mxu1 %v251_v34  ;;  %920 = vmatpush.msra.mxu2 %v907_v2  ;;  %v347_v34 = vld [vmem:[%s2364_s9 + $0x308] sm:$0xff] }
  0x49   : > { %1865 = vmatpush.msrb.mxu3 %v2384_v3  ;;  %v906_v3 = vld [vmem:[%s3485_s3 + $0x50] sm:$0xff] }
  0x4a   : > { %921 = vmatpush.msra.mxu2 %v906_v3 }
  0x4b   : > { %1866 = vmatpush.msrb.mxu3 %v2393_v5  ;;  %v366_v5 = vld [vmem:[%s2364_s9 + $0x3a0] sm:$0xff] }
  0x4d   : > { %1867 = vmatpush.msrb.mxu3 %v2402_v7  ;;  %v905_v7 = vld [vmem:[%s3485_s3 + $0x48] sm:$0xff] }
  0x4e   : > { %433 = vmatmul.f32.gmra.mxu0 %v252_v35  ;;  %577 = vmatmul.f32.gmra.mxu3 %v348_v36  ;;  %v282_v35 = vld [vmem:[%s2364_s9 + $0x100] sm:$0xff] }
  0x4f   : > { %1868 = vmatpush.msrb.mxu3 %v2411_v9  ;;  %922 = vmatpush.msra.mxu2 %v905_v7  ;;  %v903_v9 = vld [vmem:[%s3485_s3 + $0x38] sm:$0xff] }
  0x50   : > { %642 = vmatmul.f32.gmra.mxu1 %v253_v37 }
  0x51   : > { %1869 = vmatpush.msrb.mxu3 %v2420_v11  ;;  %923 = vmatpush.msra.mxu2 %v904_v8  ;;  %v272_v11 = vld [vmem:[%s2364_s9 + $0xb0] sm:$0xff] }
  0x53   : > { %1870 = vmatpush.msrb.mxu3 %v2429_v13  ;;  %924 = vmatpush.msra.mxu2 %v903_v9  ;;  %v273_v13 = vld [vmem:[%s2364_s9 + $0xb8] sm:$0xff] }
  0x55   : > { %1871 = vmatpush.msrb.mxu3 %v2438_v15  ;;  %925 = vmatpush.msra.mxu2 %v902_v10  ;;  %v900_v15 = vld [vmem:[%s3485_s3 + $0x20] sm:$0xff] }
  0x56   : > { %436 = vmatmul.f32.gmra.mxu0 %v254_v38  ;;  %580 = vmatmul.f32.gmra.mxu3 %v350_v39  ;;  %v283_v38 = vld [vmem:[%s2364_s9 + $0x108] sm:$0xff] }
  0x57   : > { %1872 = vmatpush.msrb.mxu3 %v2447_v17  ;;  %926 = vmatpush.msra.mxu2 %v901_v14  ;;  %v274_v17 = vld [vmem:[%s2364_s9 + $0xc0] sm:$0xff] }
  0x58   : > { %645 = vmatmul.f32.gmra.mxu1 %v255_v40 }
  0x59   : > { %1873 = vmatpush.msrb.mxu3 %v400_v19  ;;  %927 = vmatpush.msra.mxu2 %v900_v15  ;;  %v898_v19 = vld [vmem:[%s3485_s3 + $0x10] sm:$0xff] }
  0x5b   : > { %1874 = vmatpush.msrb.mxu3 %v399_v21  ;;  %928 = vmatpush.msra.mxu2 %v899_v16  ;;  %v897_v21 = vld [vmem:[%s3485_s3 + $0x8] sm:$0xff] }
  0x5d   : > { %1875 = vmatpush.msrb.mxu3 %v398_v23  ;;  %929 = vmatpush.msra.mxu2 %v898_v19  ;;  %v276_v23 = vld [vmem:[%s2364_s9 + $0xd0] sm:$0xff] }
  0x5e   : > { %439 = vmatmul.f32.gmra.mxu0 %v256_v41  ;;  %583 = vmatmul.f32.gmra.mxu3 %v352_v42 }
  0x5f   : > { %1876 = vmatpush.msrb.mxu3 %v397_v25  ;;  %930 = vmatpush.msra.mxu2 %v897_v21  ;;  %v277_v25 = vld [vmem:[%s2364_s9 + $0xd8] sm:$0xff] }
  0x60   : > { %648 = vmatmul.f32.gmra.mxu1 %v257_v43  ;;  %v349_v43 = vld [vmem:[%s2364_s9 + $0x318] sm:$0xff] }
  0x61   : > { %1877 = vmatpush.msrb.mxu3 %v396_v27  ;;  %931 = vmatpush.msra.mxu2 %v896_v22  ;;  %v374_v27 = vld [vmem:[%s2364_s9 + $0x3e0] sm:$0xff] }
  0x63   : > { %1878 = vmatpush.msrb.mxu3 %v395_v29  ;;  %v280_v29 = vld [vmem:[%s2364_s9 + $0xf0] sm:$0xff] }
  0x65   : > { %1879 = vmatpush.msrb.mxu3 %v394_v33 }
  0x66   : > { %442 = vmatmul.f32.gmra.mxu0 %v258_v44  ;;  %586 = vmatmul.f32.gmra.mxu3 %v354_v45  ;;  %v284_v44 = vld [vmem:[%s2364_s9 + $0x110] sm:$0xff] }
  0x67   : > { %1880 = vmatpush.msra.mxu3 %v911_v59 }
  0x68   : > { %651 = vmatmul.f32.gmra.mxu1 %v259_v46 }
  0x69   : > { %1881 = vmatpush.msra.mxu3 %v910_v60 }
  0x6b   : > { %1882 = vmatpush.msra.mxu3 %v909_v0 }
  0x6d   : > { %1883 = vmatpush.msra.mxu3 %v908_v1  ;;  %v289_v1 = vld [vmem:[%s2364_s9 + $0x138] sm:$0xff] }
  0x6e   : > { %445 = vmatmul.f32.gmra.mxu0 %v260_v47  ;;  %589 = vmatmul.f32.gmra.mxu3 %v356_v48  ;;  %v285_v47 = vld [vmem:[%s2364_s9 + $0x118] sm:$0xff] }
  0x6f   : > { %1884 = vmatpush.msra.mxu3 %v907_v2 }
  0x70   : > { %654 = vmatmul.f32.gmra.mxu1 %v261_v49 }
  0x71   : > { %1885 = vmatpush.msra.mxu3 %v906_v3 }
  0x73   : > { %1886 = vmatpush.msra.mxu3 %v905_v7  ;;  %v290_v7 = vld [vmem:[%s2364_s9 + $0x140] sm:$0xff] }
  0x75   : > { %1887 = vmatpush.msra.mxu3 %v904_v8 }
  0x76   : > { %448 = vmatmul.f32.gmra.mxu0 %v262_v50  ;;  %592 = vmatmul.f32.gmra.mxu3 %v358_v51 }
  0x77   : > { %1888 = vmatpush.msra.mxu3 %v903_v9 }
  0x78   : > { %657 = vmatmul.f32.gmra.mxu1 %v263_v52  ;;  %v351_v52 = vld [vmem:[%s2364_s9 + $0x328] sm:$0xff] }
  0x79   : > { %1889 = vmatpush.msra.mxu3 %v902_v10  ;;  %v291_v10 = vld [vmem:[%s2364_s9 + $0x148] sm:$0xff] }
  0x7b   : > { %1890 = vmatpush.msra.mxu3 %v901_v14 }
  0x7d   : > { %1891 = vmatpush.msra.mxu3 %v900_v15  ;;  %v357_v15 = vld [vmem:[%s2364_s9 + $0x358] sm:$0xff] }
  0x7e   : > { %451 = vmatmul.f32.gmra.mxu0 %v264_v53  ;;  %595 = vmatmul.f32.gmra.mxu3 %v360_v54  ;;  %v286_v53 = vld [vmem:[%s2364_s9 + $0x120] sm:$0xff] }
  0x7f   : > { %1892 = vmatpush.msra.mxu3 %v899_v16  ;;  %v292_v16 = vld [vmem:[%s2364_s9 + $0x150] sm:$0xff] }
  0x80   : > { %660 = vmatmul.f32.gmra.mxu1 %v265_v55 }
  0x81   : > { %1893 = vmatpush.msra.mxu3 %v898_v19  ;;  %v293_v19 = vld [vmem:[%s2364_s9 + $0x158] sm:$0xff] }
  0x83   : > { %1894 = vmatpush.msra.mxu3 %v897_v21 }
  0x85   : > { %1895 = vmatpush.msra.mxu3 %v896_v22 }
  0x86   : > { %454 = vmatmul.f32.gmra.mxu0 %v266_v56  ;;  %598 = vmatmul.f32.gmra.mxu3 %v362_v57  ;;  %v287_v56 = vld [vmem:[%s2364_s9 + $0x128] sm:$0xff] }
  0x88   : > { %663 = vmatmul.f32.gmra.mxu1 %v267_v58 }
  0x8e   : > { %457 = vmatmul.f32.gmra.mxu0 %v268_v61  ;;  %601 = vmatmul.f32.gmra.mxu3 %v364_v62  ;;  %v353_v61 = vld [vmem:[%s2364_s9 + $0x338] sm:$0xff]  ;;  %v288_v62 = vld [vmem:[%s2364_s9 + $0x130] sm:$0xff] }
  0x90   : > { %666 = vmatmul.f32.gmra.mxu1 %v269_v63 }
  0x96   : > { %460 = vmatmul.f32.gmra.mxu0 %v270_v4  ;;  %604 = vmatmul.f32.gmra.mxu3 %v366_v5 }
  0x98   : > { %669 = vmatmul.f32.gmra.mxu1 %v271_v6  ;;  %v355_v6 = vld [vmem:[%s2364_s9 + $0x348] sm:$0xff] }
  0x9e   : > { %463 = vmatmul.f32.gmra.mxu0 %v272_v11  ;;  %607 = vmatmul.f32.gmra.mxu3 %v368_v12 }
  0xa0   : > { %672 = vmatmul.f32.gmra.mxu1 %v273_v13 }
  0xa6   : > { %466 = vmatmul.f32.gmra.mxu0 %v274_v17  ;;  %610 = vmatmul.f32.gmra.mxu3 %v370_v18 }
  0xa8   : > { %675 = vmatmul.f32.gmra.mxu1 %v275_v20 }
  0xae   : > { %469 = vmatmul.f32.gmra.mxu0 %v276_v23  ;;  %613 = vmatmul.f32.gmra.mxu3 %v372_v24  ;;  %v359_v24 = vld [vmem:[%s2364_s9 + $0x368] sm:$0xff] }
  0xb0   : > { %678 = vmatmul.f32.gmra.mxu1 %v277_v25  ;;  %v294_v25 = vld [vmem:[%s2364_s9 + $0x160] sm:$0xff] }
  0xb6   : > { %472 = vmatmul.f32.gmra.mxu0 %v278_v26  ;;  %616 = vmatmul.f32.gmra.mxu3 %v374_v27 }
  0xb8   : > { %681 = vmatmul.f32.gmra.mxu1 %v279_v28  ;;  %v295_v28 = vld [vmem:[%s2364_s9 + $0x168] sm:$0xff] }
  0xbe   : > { %475 = vmatmul.f32.gmra.mxu0 %v280_v29  ;;  %619 = vmatmul.f32.gmra.mxu3 %v376_v30 }
  0xc0   : > { %684 = vmatmul.f32.gmra.mxu1 %v281_v31 }
  0xc3   : > { %v431_v33 = vpop.f32.mrf.mxu0 }
  0xc4   : > { %v432_v36 = vadd.f32 %v2601_v32, %v431_v33 }
  0xc5   : > { %v640_v37 = vpop.f32.mrf.mxu1 }
  0xc6   : > { %v641_v39 = vadd.f32 %v640_v37, %v432_v36  ;;  %783 = vmatmul.f32.vlgmr.msrb.gmra.mxu3 %v347_v34  ;;  %478 = vmatmul.f32.gmra.mxu0 %v282_v35  ;;  %v361_v34 = vld [vmem:[%s2364_s9 + $0x378] sm:$0xff]  ;;  %v296_v35 = vld [vmem:[%s2364_s9 + $0x170] sm:$0xff] }
  0xc8   : > { %v832_v40 = vmax.f32 %v641_v39, 0.0  ;;  %687 = vmatmul.f32.gmra.mxu1 %v283_v38  ;;  %v297_v38 = vld [vmem:[%s2364_s9 + $0x178] sm:$0xff] }
  0xc9   : > { %v2607_v41 = vpop.f32.mrf.mxu3 }
  0xca   : > { %932 = vmatmul.f32.vlgmr.msra.gmra.mxu2 %v832_v40 }
  0xcb   : > { %v434_v42 = vpop.f32.mrf.mxu0 }
  0xcc   : > { %v435_v45 = vadd.f32 %v2601_v32, %v434_v42 }
  0xcd   : > { %v643_v46 = vpop.f32.mrf.mxu1 }
  0xce   : > { %v644_v48 = vadd.f32 %v643_v46, %v435_v45  ;;  %786 = vmatmul.f32.gmra.mxu3 %v349_v43  ;;  %481 = vmatmul.f32.gmra.mxu0 %v284_v44  ;;  %v363_v44 = vld [vmem:[%s2364_s9 + $0x388] sm:$0xff]  ;;  %v298_v45 = vld [vmem:[%s2364_s9 + $0x180] sm:$0xff] }
  0xd0   : > { %v833_v49 = vmax.f32 %v644_v48, 0.0  ;;  %690 = vmatmul.f32.gmra.mxu1 %v285_v47  ;;  %v299_v48 = vld [vmem:[%s2364_s9 + $0x188] sm:$0xff] }
  0xd1   : > { %v2613_v50 = vpop.f32.mrf.mxu3 }
  0xd2   : > { %935 = vmatmul.f32.gmra.mxu2 %v833_v49 }
  0xd3   : > { %v437_v51 = vpop.f32.mrf.mxu0 }
  0xd4   : > { %v438_v54 = vadd.f32 %v2601_v32, %v437_v51 }
  0xd5   : > { %v646_v55 = vpop.f32.mrf.mxu1 }
  0xd6   : > { %v647_v57 = vadd.f32 %v646_v55, %v438_v54  ;;  %789 = vmatmul.f32.gmra.mxu3 %v351_v52  ;;  %484 = vmatmul.f32.gmra.mxu0 %v286_v53  ;;  %v365_v54 = vld [vmem:[%s2364_s9 + $0x398] sm:$0xff]  ;;  %v300_v55 = vld [vmem:[%s2364_s9 + $0x190] sm:$0xff] }
  0xd8   : > { %v834_v58 = vmax.f32 %v647_v57, 0.0  ;;  %693 = vmatmul.f32.gmra.mxu1 %v287_v56 }
  0xd9   : > { %v2619_v59 = vpop.f32.mrf.mxu3 }
  0xda   : > { %938 = vmatmul.f32.gmra.mxu2 %v834_v58  ;;  %v301_v58 = vld [vmem:[%s2364_s9 + $0x198] sm:$0xff] }
  0xdb   : > { %v440_v60 = vpop.f32.mrf.mxu0 }
  0xdc   : > { %v441_v63 = vadd.f32 %v2601_v32, %v440_v60 }
  0xdd   : > { %v649_v0 = vpop.f32.mrf.mxu1 }
  0xde   : > { %v650_v2 = vadd.f32 %v649_v0, %v441_v63  ;;  %792 = vmatmul.f32.gmra.mxu3 %v353_v61  ;;  %487 = vmatmul.f32.gmra.mxu0 %v288_v62  ;;  %v367_v0 = vld [vmem:[%s2364_s9 + $0x3a8] sm:$0xff] }
  0xe0   : > { %v835_v3 = vmax.f32 %v650_v2, 0.0  ;;  %696 = vmatmul.f32.gmra.mxu1 %v289_v1  ;;  %v302_v1 = vld [vmem:[%s2364_s9 + $0x1a0] sm:$0xff] }
  0xe1   : > { %v2625_v4 = vpop.f32.mrf.mxu3 }
  0xe2   : > { %941 = vmatmul.f32.gmra.mxu2 %v835_v3 }
  0xe3   : > { %v443_v5 = vpop.f32.mrf.mxu0 }
  0xe4   : > { %v444_v8 = vadd.f32 %v2601_v32, %v443_v5  ;;  %v303_v5 = vld [vmem:[%s2364_s9 + $0x1a8] sm:$0xff] }
  0xe5   : > { %v652_v9 = vpop.f32.mrf.mxu1 }
  0xe6   : > { %v653_v11 = vadd.f32 %v652_v9, %v444_v8  ;;  %795 = vmatmul.f32.gmra.mxu3 %v355_v6  ;;  %490 = vmatmul.f32.gmra.mxu0 %v290_v7 }
  0xe8   : > { %v836_v12 = vmax.f32 %v653_v11, 0.0  ;;  %699 = vmatmul.f32.gmra.mxu1 %v291_v10  ;;  %v369_v10 = vld [vmem:[%s2364_s9 + $0x3b8] sm:$0xff]  ;;  %v304_v11 = vld [vmem:[%s2364_s9 + $0x1b0] sm:$0xff] }
  0xe9   : > { %v2631_v13 = vpop.f32.mrf.mxu3 }
  0xea   : > { %944 = vmatmul.f32.gmra.mxu2 %v836_v12 }
  0xeb   : > { %v446_v14 = vpop.f32.mrf.mxu0 }
  0xec   : > { %v447_v17 = vadd.f32 %v2601_v32, %v446_v14 }
  0xed   : > { %v655_v18 = vpop.f32.mrf.mxu1 }
  0xee   : > { %v656_v20 = vadd.f32 %v655_v18, %v447_v17  ;;  %798 = vmatmul.f32.gmra.mxu3 %v357_v15  ;;  %493 = vmatmul.f32.gmra.mxu0 %v292_v16  ;;  %v305_v15 = vld [vmem:[%s2364_s9 + $0x1b8] sm:$0xff] }
  0xf0   : > { %v837_v21 = vmax.f32 %v656_v20, 0.0  ;;  %702 = vmatmul.f32.gmra.mxu1 %v293_v19  ;;  %v371_v20 = vld [vmem:[%s2364_s9 + $0x3c8] sm:$0xff] }
  0xf1   : > { %v2637_v22 = vpop.f32.mrf.mxu3 }
  0xf2   : > { %947 = vmatmul.f32.gmra.mxu2 %v837_v21  ;;  %v306_v21 = vld [vmem:[%s2364_s9 + $0x1c0] sm:$0xff] }
  0xf3   : > { %v449_v23 = vpop.f32.mrf.mxu0 }
  0xf4   : > { %v450_v26 = vadd.f32 %v2601_v32, %v449_v23 }
  0xf5   : > { %v658_v27 = vpop.f32.mrf.mxu1 }
  0xf6   : > { %v659_v29 = vadd.f32 %v658_v27, %v450_v26  ;;  %801 = vmatmul.f32.gmra.mxu3 %v359_v24  ;;  %496 = vmatmul.f32.gmra.mxu0 %v294_v25  ;;  %v307_v25 = vld [vmem:[%s2364_s9 + $0x1c8] sm:$0xff] }
  0xf8   : > { %v838_v30 = vmax.f32 %v659_v29, 0.0  ;;  %705 = vmatmul.f32.gmra.mxu1 %v295_v28 }
  0xf9   : > { %v2643_v31 = vpop.f32.mrf.mxu3 }
  0xfa   : > { %950 = vmatmul.f32.gmra.mxu2 %v838_v30  ;;  %v373_v30 = vld [vmem:[%s2364_s9 + $0x3d8] sm:$0xff] }
  0xfb   : > { %v452_v33 = vpop.f32.mrf.mxu0 }
  0xfc   : > { %v453_v36 = vadd.f32 %v2601_v32, %v452_v33  ;;  %v308_v33 = vld [vmem:[%s2364_s9 + $0x1d0] sm:$0xff] }
  0xfd   : > { %v661_v37 = vpop.f32.mrf.mxu1 }
  0xfe   : > { %v662_v39 = vadd.f32 %v661_v37, %v453_v36  ;;  %804 = vmatmul.f32.gmra.mxu3 %v361_v34  ;;  %499 = vmatmul.f32.gmra.mxu0 %v296_v35  ;;  %v309_v36 = vld [vmem:[%s2364_s9 + $0x1d8] sm:$0xff] }
 0x100   : > { %v839_v40 = vmax.f32 %v662_v39, 0.0  ;;  %708 = vmatmul.f32.gmra.mxu1 %v297_v38 }
 0x101   : > { %v2649_v42 = vpop.f32.mrf.mxu3 }
 0x102   : > { %953 = vmatmul.f32.gmra.mxu2 %v839_v40 }
 0x103   : > { %v455_v43 = vpop.f32.mrf.mxu0 }
 0x104   : > { %v456_v46 = vadd.f32 %v2601_v32, %v455_v43  ;;  %v375_v43 = vld [vmem:[%s2364_s9 + $0x3e8] sm:$0xff] }
 0x105   : > { %v664_v47 = vpop.f32.mrf.mxu1 }
 0x106   : > { %v665_v49 = vadd.f32 %v664_v47, %v456_v46  ;;  %807 = vmatmul.f32.gmra.mxu3 %v363_v44  ;;  %502 = vmatmul.f32.gmra.mxu0 %v298_v45  ;;  %v310_v44 = vld [vmem:[%s2364_s9 + $0x1e0] sm:$0xff]  ;;  %v311_v47 = vld [vmem:[%s2364_s9 + $0x1e8] sm:$0xff] }
 0x108   : > { %v840_v51 = vmax.f32 %v665_v49, 0.0  ;;  %711 = vmatmul.f32.gmra.mxu1 %v299_v48 }
 0x109   : > { %v2655_v52 = vpop.f32.mrf.mxu3 }
 0x10a   : > { %956 = vmatmul.f32.gmra.mxu2 %v840_v51 }
 0x10b   : > { %v458_v53 = vpop.f32.mrf.mxu0 }
 0x10c   : > { %v459_v56 = vadd.f32 %v2601_v32, %v458_v53 }
 0x10d   : > { %v667_v57 = vpop.f32.mrf.mxu1 }
 0x10e   : > { %v668_v60 = vadd.f32 %v667_v57, %v459_v56  ;;  %810 = vmatmul.f32.gmra.mxu3 %v365_v54  ;;  %505 = vmatmul.f32.gmra.mxu0 %v300_v55  ;;  %v377_v54 = vld [vmem:[%s2364_s9 + $0x3f8] sm:$0xff]  ;;  %v312_v55 = vld [vmem:[%s2364_s9 + $0x1f0] sm:$0xff] }
 0x110   : > { %v841_v61 = vmax.f32 %v668_v60, 0.0  ;;  %714 = vmatmul.f32.gmra.mxu1 %v301_v58  ;;  %v313_v58 = vld [vmem:[%s2364_s9 + $0x1f8] sm:$0xff] }
 0x111   : > { %v2661_v62 = vpop.f32.mrf.mxu3 }
 0x112   : > { %959 = vmatmul.f32.gmra.mxu2 %v841_v61 }
 0x113   : > { %v461_v63 = vpop.f32.mrf.mxu0 }
 0x114   : > { %v462_v2 = vadd.f32 %v2601_v32, %v461_v63 }
 0x115   : > { %v670_v3 = vpop.f32.mrf.mxu1 }
 0x116   : > { %v671_v6 = vadd.f32 %v670_v3, %v462_v2  ;;  %813 = vmatmul.f32.gmra.mxu3 %v367_v0  ;;  %508 = vmatmul.f32.gmra.mxu0 %v302_v1  ;;  %v314_v1 = vld [vmem:[%s2364_s9 + $0x200] sm:$0xff] }
 0x118   : > { %v842_v7 = vmax.f32 %v671_v6, 0.0  ;;  %717 = vmatmul.f32.gmra.mxu1 %v303_v5  ;;  %v315_v5 = vld [vmem:[%s2364_s9 + $0x208] sm:$0xff] }
 0x119   : > { %v2667_v8 = vpop.f32.mrf.mxu3 }
 0x11a   : > { %962 = vmatmul.f32.gmra.mxu2 %v842_v7  ;;  %v576_v7 = vadd.f32 %v2601_v32, %v2607_v41 }
 0x11b   : > { %v464_v9 = vpop.f32.mrf.mxu0 }
 0x11c   : > { %v465_v12 = vadd.f32 %v2601_v32, %v464_v9 }
 0x11d   : > { %v673_v14 = vpop.f32.mrf.mxu1 }
 0x11e   : > { %v674_v16 = vadd.f32 %v673_v14, %v465_v12  ;;  %816 = vmatmul.f32.gmra.mxu3 %v369_v10  ;;  %511 = vmatmul.f32.gmra.mxu0 %v304_v11  ;;  %v2707_v12 = vld [vmem:[%s3486_s4] ss:$0 sm:$0xff] }
 0x120   : > { %v843_v17 = vmax.f32 %v674_v16, 0.0  ;;  %720 = vmatmul.f32.gmra.mxu1 %v305_v15  ;;  %v316_v15 = vld [vmem:[%s2364_s9 + $0x210] sm:$0xff] }
 0x121   : > { %v2673_v18 = vpop.f32.mrf.mxu3 }
 0x122   : > { %965 = vmatmul.f32.gmra.mxu2 %v843_v17 }
 0x123   : > { %v467_v19 = vpop.f32.mrf.mxu0 }
 0x124   : > { %v468_v23 = vadd.f32 %v2601_v32, %v467_v19 }
 0x125   : > { %v676_v24 = vpop.f32.mrf.mxu1 }
 0x126   : > { %v677_v26 = vadd.f32 %v676_v24, %v468_v23  ;;  %819 = vmatmul.f32.gmra.mxu3 %v371_v20  ;;  %514 = vmatmul.f32.gmra.mxu0 %v306_v21  ;;  %v317_v21 = vld [vmem:[%s2364_s9 + $0x218] sm:$0xff]  ;;  %v579_v24 = vadd.f32 %v2601_v32, %v2613_v50 }
 0x128   : > { %v844_v27 = vmax.f32 %v677_v26, 0.0  ;;  %723 = vmatmul.f32.gmra.mxu1 %v307_v25 }
 0x129   : > { %v2679_v28 = vpop.f32.mrf.mxu3 }
 0x12a   : > { %968 = vmatmul.f32.gmra.mxu2 %v844_v27 }
 0x12b   : > { %v470_v29 = vpop.f32.mrf.mxu0 }
 0x12c   : > { %v471_v34 = vadd.f32 %v2601_v32, %v470_v29 }
 0x12d   : > { %v679_v35 = vpop.f32.mrf.mxu1 }
 0x12e   : > { %v680_v37 = vadd.f32 %v679_v35, %v471_v34  ;;  %822 = vmatmul.f32.gmra.mxu3 %v373_v30  ;;  %517 = vmatmul.f32.gmra.mxu0 %v308_v33  ;;  %v318_v30 = vld [vmem:[%s2364_s9 + $0x220] sm:$0xff] }
 0x130   : > { %v845_v38 = vmax.f32 %v680_v37, 0.0  ;;  %726 = vmatmul.f32.gmra.mxu1 %v309_v36  ;;  %v319_v37 = vld [vmem:[%s2364_s9 + $0x228] sm:$0xff] }
 0x131   : > { %v2685_v39 = vpop.f32.mrf.mxu3 }
 0x132   : > { %971 = vmatmul.f32.gmra.mxu2 %v845_v38 }
 0x133   : > { %v473_v40 = vpop.f32.mrf.mxu0 }
 0x134   : > { %v474_v45 = vadd.f32 %v2601_v32, %v473_v40  ;;  %v582_v40 = vadd.f32 %v2601_v32, %v2619_v59 }
 0x135   : > { %v682_v46 = vpop.f32.mrf.mxu1 }
 0x136   : > { %v683_v48 = vadd.f32 %v682_v46, %v474_v45  ;;  %825 = vmatmul.f32.gmra.mxu3 %v375_v43  ;;  %520 = vmatmul.f32.gmra.mxu0 %v310_v44 }
 0x138   : > { %v846_v49 = vmax.f32 %v683_v48, 0.0  ;;  %729 = vmatmul.f32.gmra.mxu1 %v311_v47  ;;  %v320_v47 = vld [vmem:[%s2364_s9 + $0x230] sm:$0xff] }
 0x139   : > { %v2691_v51 = vpop.f32.mrf.mxu3 }
 0x13a   : > { %974 = vmatmul.f32.gmra.mxu2 %v846_v49 }
 0x13b   : > { %v476_v53 = vpop.f32.mrf.mxu0 }
 0x13c   : > { %v477_v56 = vadd.f32 %v2601_v32, %v476_v53 }
 0x13d   : > { %v685_v57 = vpop.f32.mrf.mxu1 }
 0x13e   : > { %v686_v60 = vadd.f32 %v685_v57, %v477_v56  ;;  %828 = vmatmul.f32.gmra.mxu3 %v377_v54  ;;  %523 = vmatmul.f32.gmra.mxu0 %v312_v55  ;;  %v321_v55 = vld [vmem:[%s2364_s9 + $0x238] sm:$0xff]  ;;  %v585_v57 = vadd.f32 %v2601_v32, %v2625_v4 }
 0x140   : > { %v847_v61 = vmax.f32 %v686_v60, 0.0  ;;  %732 = vmatmul.f32.gmra.mxu1 %v313_v58 }
 0x141   : > { %v2697_v63 = vpop.f32.mrf.mxu3 }
 0x142   : > { %977 = vmatmul.f32.gmra.mxu2 %v847_v61 }
 0x143   : > { %v479_v0 = vpop.f32.mrf.mxu0 }
 0x144   : > { %v480_v2 = vadd.f32 %v2601_v32, %v479_v0 }
 0x145   : > { %v688_v3 = vpop.f32.mrf.mxu1 }
 0x146   : > { %v689_v6 = vadd.f32 %v688_v3, %v480_v2  ;;  %526 = vmatmul.f32.gmra.mxu0 %v314_v1  ;;  %v322_v1 = vld [vmem:[%s2364_s9 + $0x240] sm:$0xff] }
 0x148   : > { %v848_v9 = vmax.f32 %v689_v6, 0.0  ;;  %735 = vmatmul.f32.gmra.mxu1 %v315_v5 }
 0x149   : > { %v784_v10 = vpop.f32.mrf.mxu3 }
 0x14a   : > { %v785_v11 = vadd.f32 %v784_v10, %v576_v7  ;;  %980 = vmatmul.f32.gmra.mxu2 %v848_v9  ;;  %v323_v7 = vld [vmem:[%s2364_s9 + $0x248] sm:$0xff]  ;;  %v588_v10 = vadd.f32 %v2601_v32, %v2631_v13 }
 0x14b   : > { %v482_v14 = vpop.f32.mrf.mxu0 }
 0x14c   : > { %v880_v16 = vmax.f32 %v785_v11, 0.0  ;;  %v483_v17 = vadd.f32 %v2601_v32, %v482_v14 }
 0x14d   : > { %v933_v19 = vpop.f32.mrf.mxu2  ;;  %v691_v20 = vpop.f32.mrf.mxu1 }
 0x14e   : > { %1076 = vmatmul.f32.vlgmr.msra.gmra.mxu3 %v880_v16  ;;  %v2713_v41 = vadd.f32 %v2707_v12, %v933_v19  ;;  %v692_v23 = vadd.f32 %v691_v20, %v483_v17  ;;  %529 = vmatmul.f32.gmra.mxu0 %v316_v15  ;;  %v324_v17 = vld [vmem:[%s2364_s9 + $0x250] sm:$0xff] }
 0x150   : > { %1125 = vmax.xlane.f32.xlu0 %v2713_v41  ;;  %v849_v25 = vmax.f32 %v692_v23, 0.0  ;;  %738 = vmatmul.f32.gmra.mxu1 %v317_v21 }
 0x151   : > { %v787_v26 = vpop.f32.mrf.mxu3 }
 0x152   : > { %v788_v27 = vadd.f32 %v787_v26, %v579_v24  ;;  %983 = vmatmul.f32.gmra.mxu2 %v849_v25  ;;  %v325_v24 = vld [vmem:[%s2364_s9 + $0x258] sm:$0xff]  ;;  %v591_v26 = vadd.f32 %v2601_v32, %v2637_v22 }
 0x153   : > { %v485_v29 = vpop.f32.mrf.mxu0 }
 0x154   : > { %v881_v33 = vmax.f32 %v788_v27, 0.0  ;;  %v486_v34 = vadd.f32 %v2601_v32, %v485_v29 }
 0x155   : > { %v936_v35 = vpop.f32.mrf.mxu2  ;;  %v694_v36 = vpop.f32.mrf.mxu1 }
 0x156   : > { %1079 = vmatmul.f32.gmra.mxu3 %v881_v33  ;;  %v2722_v38 = vadd.f32 %v2707_v12, %v936_v35  ;;  %v695_v50 = vadd.f32 %v694_v36, %v486_v34  ;;  %532 = vmatmul.f32.gmra.mxu0 %v318_v30  ;;  %v326_v34 = vld [vmem:[%s2364_s9 + $0x260] sm:$0xff] }
 0x158   : > { %1127 = vmax.xlane.f32.xlu0 %v2722_v38  ;;  %v850_v43 = vmax.f32 %v695_v50, 0.0  ;;  %741 = vmatmul.f32.gmra.mxu1 %v319_v37 }
 0x159   : > { %v790_v44 = vpop.f32.mrf.mxu3 }
 0x15a   : > { %v791_v45 = vadd.f32 %v790_v44, %v582_v40  ;;  %986 = vmatmul.f32.gmra.mxu2 %v850_v43  ;;  %v327_v40 = vld [vmem:[%s2364_s9 + $0x268] sm:$0xff]  ;;  %v594_v44 = vadd.f32 %v2601_v32, %v2643_v31 }
 0x15b   : > { %v488_v46 = vpop.f32.mrf.mxu0 }
 0x15c   : > { %v882_v48 = vmax.f32 %v791_v45, 0.0  ;;  %v489_v49 = vadd.f32 %v2601_v32, %v488_v46 }
 0x15d   : > { %v939_v53 = vpop.f32.mrf.mxu2  ;;  %v697_v54 = vpop.f32.mrf.mxu1 }
 0x15e   : > { %1082 = vmatmul.f32.gmra.mxu3 %v882_v48  ;;  %v2731_v56 = vadd.f32 %v2707_v12, %v939_v53  ;;  %v698_v59 = vadd.f32 %v697_v54, %v489_v49  ;;  %535 = vmatmul.f32.gmra.mxu0 %v320_v47  ;;  %v328_v49 = vld [vmem:[%s2364_s9 + $0x270] sm:$0xff] }
 0x160   : > { %1129 = vmax.xlane.f32.xlu1 %v2731_v56  ;;  %v851_v58 = vmax.f32 %v698_v59, 0.0  ;;  %744 = vmatmul.f32.gmra.mxu1 %v321_v55 }
 0x161   : > { %v793_v60 = vpop.f32.mrf.mxu3 }
 0x162   : > { %v794_v61 = vadd.f32 %v793_v60, %v585_v57  ;;  %989 = vmatmul.f32.gmra.mxu2 %v851_v58  ;;  %v329_v57 = vld [vmem:[%s2364_s9 + $0x278] sm:$0xff]  ;;  %v597_v60 = vadd.f32 %v2601_v32, %v2649_v42 }
 0x163   : > { %v491_v0 = vpop.f32.mrf.mxu0 }
 0x164   : > { %v883_v2 = vmax.f32 %v794_v61, 0.0  ;;  %v492_v3 = vadd.f32 %v2601_v32, %v491_v0 }
 0x165   : > { %v942_v5 = vpop.f32.mrf.mxu2  ;;  %v700_v6 = vpop.f32.mrf.mxu1 }
 0x166   : > { %1085 = vmatmul.f32.gmra.mxu3 %v883_v2  ;;  %v2740_v9 = vadd.f32 %v2707_v12, %v942_v5  ;;  %v701_v4 = vadd.f32 %v700_v6, %v492_v3  ;;  %538 = vmatmul.f32.gmra.mxu0 %v322_v1  ;;  %v330_v3 = vld [vmem:[%s2364_s9 + $0x280] sm:$0xff] }
 0x168   : > { %1131 = vmax.xlane.f32.xlu1 %v2740_v9  ;;  %v852_v11 = vmax.f32 %v701_v4, 0.0  ;;  %747 = vmatmul.f32.gmra.mxu1 %v323_v7 }
 0x169   : > { %v796_v14 = vpop.f32.mrf.mxu3 }
 0x16a   : > { %v797_v15 = vadd.f32 %v796_v14, %v588_v10  ;;  %992 = vmatmul.f32.gmra.mxu2 %v852_v11  ;;  %v331_v10 = vld [vmem:[%s2364_s9 + $0x288] sm:$0xff]  ;;  %v600_v14 = vadd.f32 %v2601_v32, %v2655_v52 }
 0x16b   : > { %v494_v16 = vpop.f32.mrf.mxu0 }
 0x16c   : > { %v884_v19 = vmax.f32 %v797_v15, 0.0  ;;  %v495_v20 = vadd.f32 %v2601_v32, %v494_v16 }
 0x16d   : > { %v945_v21 = vpop.f32.mrf.mxu2  ;;  %v703_v23 = vpop.f32.mrf.mxu1 }
 0x16e   : > { %1088 = vmatmul.f32.gmra.mxu3 %v884_v19  ;;  %v2749_v25 = vadd.f32 %v2707_v12, %v945_v21  ;;  %v704_v13 = vadd.f32 %v703_v23, %v495_v20  ;;  %541 = vmatmul.f32.gmra.mxu0 %v324_v17  ;;  %v332_v20 = vld [vmem:[%s2364_s9 + $0x290] sm:$0xff] }
 0x170   : > { %1133 = vmax.xlane.f32.xlu2 %v2749_v25  ;;  %v853_v27 = vmax.f32 %v704_v13, 0.0  ;;  %750 = vmatmul.f32.gmra.mxu1 %v325_v24 }
 0x171   : > { %v799_v29 = vpop.f32.mrf.mxu3 }
 0x172   : > { %v800_v30 = vadd.f32 %v799_v29, %v591_v26  ;;  %995 = vmatmul.f32.gmra.mxu2 %v853_v27  ;;  %v333_v26 = vld [vmem:[%s2364_s9 + $0x298] sm:$0xff]  ;;  %v603_v29 = vadd.f32 %v2601_v32, %v2661_v62 }
 0x173   : > { %v497_v33 = vpop.f32.mrf.mxu0 }
 0x174   : > { %v885_v35 = vmax.f32 %v800_v30, 0.0  ;;  %v498_v36 = vadd.f32 %v2601_v32, %v497_v33 }
 0x175   : > { %v948_v37 = vpop.f32.mrf.mxu2  ;;  %v706_v50 = vpop.f32.mrf.mxu1 }
 0x176   : > { %1091 = vmatmul.f32.gmra.mxu3 %v885_v35  ;;  %v2758_v43 = vadd.f32 %v2707_v12, %v948_v37  ;;  %v707_v22 = vadd.f32 %v706_v50, %v498_v36  ;;  %544 = vmatmul.f32.gmra.mxu0 %v326_v34  ;;  %v334_v36 = vld [vmem:[%s2364_s9 + $0x2a0] sm:$0xff] }
 0x178   : > { %1135 = vmax.xlane.f32.xlu2 %v2758_v43  ;;  %v854_v45 = vmax.f32 %v707_v22, 0.0  ;;  %753 = vmatmul.f32.gmra.mxu1 %v327_v40 }
 0x179   : > { %v802_v46 = vpop.f32.mrf.mxu3 }
 0x17a   : > { %v803_v47 = vadd.f32 %v802_v46, %v594_v44  ;;  %998 = vmatmul.f32.gmra.mxu2 %v854_v45  ;;  %v335_v44 = vld [vmem:[%s2364_s9 + $0x2a8] sm:$0xff]  ;;  %v606_v46 = vadd.f32 %v2601_v32, %v2667_v8 }
 0x17b   : > { %v500_v48 = vpop.f32.mrf.mxu0 }
 0x17c   : > { %v886_v53 = vmax.f32 %v803_v47, 0.0  ;;  %v501_v54 = vadd.f32 %v2601_v32, %v500_v48 }
 0x17d   : > { %v951_v55 = vpop.f32.mrf.mxu2  ;;  %v709_v59 = vpop.f32.mrf.mxu1 }
 0x17e   : > { %1094 = vmatmul.f32.gmra.mxu3 %v886_v53  ;;  %v2767_v58 = vadd.f32 %v2707_v12, %v951_v55  ;;  %v710_v31 = vadd.f32 %v709_v59, %v501_v54  ;;  %547 = vmatmul.f32.gmra.mxu0 %v328_v49  ;;  %v336_v54 = vld [vmem:[%s2364_s9 + $0x2b0] sm:$0xff] }
 0x180   : > { %1137 = vmax.xlane.f32.xlu0 %v2767_v58  ;;  %v855_v61 = vmax.f32 %v710_v31, 0.0  ;;  %756 = vmatmul.f32.gmra.mxu1 %v329_v57 }
 0x181   : > { %v805_v0 = vpop.f32.mrf.mxu3 }
 0x182   : > { %v806_v1 = vadd.f32 %v805_v0, %v597_v60  ;;  %1001 = vmatmul.f32.gmra.mxu2 %v855_v61  ;;  %v337_v60 = vld [vmem:[%s2364_s9 + $0x2b8] sm:$0xff]  ;;  %v609_v0 = vadd.f32 %v2601_v32, %v2673_v18 }
 0x183   : > { %v503_v2 = vpop.f32.mrf.mxu0 }
 0x184   : > { %v887_v5 = vmax.f32 %v806_v1, 0.0  ;;  %v504_v6 = vadd.f32 %v2601_v32, %v503_v2 }
 0x185   : > { %v954_v7 = vpop.f32.mrf.mxu2  ;;  %v712_v4 = vpop.f32.mrf.mxu1 }
 0x186   : > { %1097 = vmatmul.f32.gmra.mxu3 %v887_v5  ;;  %v2776_v11 = vadd.f32 %v2707_v12, %v954_v7  ;;  %v713_v42 = vadd.f32 %v712_v4, %v504_v6  ;;  %550 = vmatmul.f32.gmra.mxu0 %v330_v3  ;;  %v338_v6 = vld [vmem:[%s2364_s9 + $0x2c0] sm:$0xff] }
 0x188   : > { %1139 = vmax.xlane.f32.xlu1 %v2776_v11  ;;  %v856_v15 = vmax.f32 %v713_v42, 0.0  ;;  %759 = vmatmul.f32.gmra.mxu1 %v331_v10 }
 0x189   : > { %v808_v16 = vpop.f32.mrf.mxu3 }
 0x18a   : > { %v809_v17 = vadd.f32 %v808_v16, %v600_v14  ;;  %1004 = vmatmul.f32.gmra.mxu2 %v856_v15  ;;  %v339_v14 = vld [vmem:[%s2364_s9 + $0x2c8] sm:$0xff]  ;;  %v612_v16 = vadd.f32 %v2601_v32, %v2679_v28 }
 0x18b   : > { %v506_v19 = vpop.f32.mrf.mxu0 }
 0x18c   : > { %v888_v21 = vmax.f32 %v809_v17, 0.0  ;;  %v507_v23 = vadd.f32 %v2601_v32, %v506_v19 }
 0x18d   : > { %v957_v24 = vpop.f32.mrf.mxu2  ;;  %v715_v13 = vpop.f32.mrf.mxu1 }
 0x18e   : > { %1100 = vmatmul.f32.gmra.mxu3 %v888_v21  ;;  %v2785_v27 = vadd.f32 %v2707_v12, %v957_v24  ;;  %v716_v52 = vadd.f32 %v715_v13, %v507_v23  ;;  %553 = vmatmul.f32.gmra.mxu0 %v332_v20  ;;  %v340_v23 = vld [vmem:[%s2364_s9 + $0x2d0] sm:$0xff] }
 0x190   : > { %1141 = vmax.xlane.f32.xlu2 %v2785_v27  ;;  %v857_v30 = vmax.f32 %v716_v52, 0.0  ;;  %762 = vmatmul.f32.gmra.mxu1 %v333_v26 }
 0x191   : > { %v811_v33 = vpop.f32.mrf.mxu3 }
 0x192   : > { %v812_v34 = vadd.f32 %v811_v33, %v603_v29  ;;  %1007 = vmatmul.f32.gmra.mxu2 %v857_v30  ;;  %v341_v29 = vld [vmem:[%s2364_s9 + $0x2d8] sm:$0xff]  ;;  %v615_v33 = vadd.f32 %v2601_v32, %v2685_v39 }
 0x193   : > { %v509_v35 = vpop.f32.mrf.mxu0 }
 0x194   : > { %v889_v37 = vmax.f32 %v812_v34, 0.0  ;;  %v510_v50 = vadd.f32 %v2601_v32, %v509_v35 }
 0x195   : > { %v960_v40 = vpop.f32.mrf.mxu2  ;;  %v718_v22 = vpop.f32.mrf.mxu1 }
 0x196   : > { %1103 = vmatmul.f32.gmra.mxu3 %v889_v37  ;;  %v2794_v45 = vadd.f32 %v2707_v12, %v960_v40  ;;  %v719_v62 = vadd.f32 %v718_v22, %v510_v50  ;;  %556 = vmatmul.f32.gmra.mxu0 %v334_v36  ;;  %v342_v50 = vld [vmem:[%s2364_s9 + $0x2e0] sm:$0xff] }
 0x198   : > { %1143 = vmax.xlane.f32.xlu0 %v2794_v45  ;;  %v858_v47 = vmax.f32 %v719_v62, 0.0  ;;  %765 = vmatmul.f32.gmra.mxu1 %v335_v44 }
 0x199   : > { %v814_v48 = vpop.f32.mrf.mxu3 }
 0x19a   : > { %v815_v49 = vadd.f32 %v814_v48, %v606_v46  ;;  %1010 = vmatmul.f32.gmra.mxu2 %v858_v47  ;;  %v343_v46 = vld [vmem:[%s2364_s9 + $0x2e8] sm:$0xff]  ;;  %v618_v48 = vadd.f32 %v2601_v32, %v2691_v51 }
 0x19b   : > { %v512_v53 = vpop.f32.mrf.mxu0 }
 0x19c   : > { %v890_v55 = vmax.f32 %v815_v49, 0.0  ;;  %v513_v59 = vadd.f32 %v2601_v32, %v512_v53 }
 0x19d   : > { %v963_v57 = vpop.f32.mrf.mxu2  ;;  %v721_v31 = vpop.f32.mrf.mxu1 }
 0x19e   : > { %1106 = vmatmul.f32.gmra.mxu3 %v890_v55  ;;  %v2803_v61 = vadd.f32 %v2707_v12, %v963_v57  ;;  %v722_v8 = vadd.f32 %v721_v31, %v513_v59  ;;  %559 = vmatmul.f32.gmra.mxu0 %v336_v54  ;;  %v344_v59 = vld [vmem:[%s2364_s9 + $0x2f0] sm:$0xff] }
 0x1a0   : > { %1145 = vmax.xlane.f32.xlu1 %v2803_v61  ;;  %v859_v1 = vmax.f32 %v722_v8, 0.0  ;;  %768 = vmatmul.f32.gmra.mxu1 %v337_v60 }
 0x1a1   : > { %v817_v2 = vpop.f32.mrf.mxu3 }
 0x1a2   : > { %v818_v3 = vadd.f32 %v817_v2, %v609_v0  ;;  %1013 = vmatmul.f32.gmra.mxu2 %v859_v1  ;;  %v345_v0 = vld [vmem:[%s2364_s9 + $0x2f8] sm:$0xff]  ;;  %v621_v2 = vadd.f32 %v2601_v32, %v2697_v63 }
 0x1a3   : > { %v515_v5 = vpop.f32.mrf.mxu0 }
 0x1a4   : > { %v891_v7 = vmax.f32 %v818_v3, 0.0  ;;  %v516_v4 = vadd.f32 %v2601_v32, %v515_v5 }
 0x1a5   : > { %v966_v10 = vpop.f32.mrf.mxu2  ;;  %v724_v42 = vpop.f32.mrf.mxu1 }
 0x1a6   : > { %1109 = vmatmul.f32.gmra.mxu3 %v891_v7  ;;  %v2812_v15 = vadd.f32 %v2707_v12, %v966_v10  ;;  %v725_v18 = vadd.f32 %v724_v42, %v516_v4  ;;  %562 = vmatmul.f32.gmra.mxu0 %v338_v6 }
 0x1a8   : > { %1147 = vmax.xlane.f32.xlu2 %v2812_v15  ;;  %v860_v17 = vmax.f32 %v725_v18, 0.0  ;;  %771 = vmatmul.f32.gmra.mxu1 %v339_v14 }
 0x1a9   : > { %v820_v19 = vpop.f32.mrf.mxu3 }
 0x1aa   : > { %v821_v20 = vadd.f32 %v820_v19, %v612_v16  ;;  %1016 = vmatmul.f32.gmra.mxu2 %v860_v17 }
 0x1ab   : > { %v518_v21 = vpop.f32.mrf.mxu0 }
 0x1ac   : > { %v892_v24 = vmax.f32 %v821_v20, 0.0  ;;  %v519_v13 = vadd.f32 %v2601_v32, %v518_v21 }
 0x1ad   : > { %v969_v26 = vpop.f32.mrf.mxu2  ;;  %v727_v52 = vpop.f32.mrf.mxu1 }
 0x1ae   : > { %1112 = vmatmul.f32.gmra.mxu3 %v892_v24  ;;  %v2821_v30 = vadd.f32 %v2707_v12, %v969_v26  ;;  %v728_v28 = vadd.f32 %v727_v52, %v519_v13  ;;  %565 = vmatmul.f32.gmra.mxu0 %v340_v23 }
 0x1b0   : > { %1149 = vmax.xlane.f32.xlu0 %v2821_v30  ;;  %v861_v34 = vmax.f32 %v728_v28, 0.0  ;;  %774 = vmatmul.f32.gmra.mxu1 %v341_v29 }
 0x1b1   : > { %v823_v35 = vpop.f32.mrf.mxu3 }
 0x1b2   : > { %v824_v36 = vadd.f32 %v823_v35, %v615_v33  ;;  %1019 = vmatmul.f32.gmra.mxu2 %v861_v34 }
 0x1b3   : > { %v521_v37 = vpop.f32.mrf.mxu0 }
 0x1b4   : > { %v893_v40 = vmax.f32 %v824_v36, 0.0  ;;  %v522_v22 = vadd.f32 %v2601_v32, %v521_v37 }
 0x1b5   : > { %v972_v44 = vpop.f32.mrf.mxu2  ;;  %v730_v62 = vpop.f32.mrf.mxu1 }
 0x1b6   : > { %1115 = vmatmul.f32.gmra.mxu3 %v893_v40  ;;  %v2830_v47 = vadd.f32 %v2707_v12, %v972_v44  ;;  %v731_v39 = vadd.f32 %v730_v62, %v522_v22  ;;  %568 = vmatmul.f32.gmra.mxu0 %v342_v50  ;;  %v2866_v50 = vld [vmem:[%s3484_s2] ss:$0 sm:$0xff] }
 0x1b8   : > { %1151 = vmax.xlane.f32.xlu1 %v2830_v47  ;;  %v862_v49 = vmax.f32 %v731_v39, 0.0  ;;  %777 = vmatmul.f32.gmra.mxu1 %v343_v46 }
 0x1b9   : > { %v826_v53 = vpop.f32.mrf.mxu3 }
 0x1ba   : > { %v827_v54 = vadd.f32 %v826_v53, %v618_v48  ;;  %1022 = vmatmul.f32.gmra.mxu2 %v862_v49 }
 0x1bb   : > { %v524_v55 = vpop.f32.mrf.mxu0 }
 0x1bc   : > { %v894_v57 = vmax.f32 %v827_v54, 0.0  ;;  %v525_v31 = vadd.f32 %v2601_v32, %v524_v55 }
 0x1bd   : > { %v975_v60 = vpop.f32.mrf.mxu2  ;;  %v733_v8 = vpop.f32.mrf.mxu1 }
 0x1be   : > { %1118 = vmatmul.f32.gmra.mxu3 %v894_v57  ;;  %v2839_v1 = vadd.f32 %v2707_v12, %v975_v60  ;;  %v734_v51 = vadd.f32 %v733_v8, %v525_v31  ;;  %571 = vmatmul.f32.gmra.mxu0 %v344_v59 }
 0x1c0   : > { %1153 = vmax.xlane.f32.xlu2 %v2839_v1  ;;  %v863_v3 = vmax.f32 %v734_v51, 0.0  ;;  %780 = vmatmul.f32.gmra.mxu1 %v345_v0 }
 0x1c1   : > { %v829_v5 = vpop.f32.mrf.mxu3 }
 0x1c2   : > { %v830_v6 = vadd.f32 %v829_v5, %v621_v2  ;;  %1025 = vmatmul.f32.gmra.mxu2 %v863_v3 }
 0x1c3   : > { %v1126_v7 = vpop.xlane.xlu0 %1125  ;;  %v527_v4 = vpop.f32.mrf.mxu0 }
 0x1c4   : > { %v895_v10 = vmax.f32 %v830_v6, 0.0  ;;  %v1253_v42 = vsub.f32 %v2713_v41, %v1126_v7  ;;  %v528_v14 = vadd.f32 %v2601_v32, %v527_v4 }
 0x1c5   : > { %v978_v18 = vpop.f32.mrf.mxu2  ;;  %v736_v16 = vpop.f32.mrf.mxu1 }
 0x1c6   : > { %v1317_v17 = vmul.f32 1.442695, %v1253_v42  ;;  %1121 = vmatmul.f32.gmra.mxu3 %v895_v10  ;;  %v2847_v63 = vadd.f32 %v2707_v12, %v978_v18  ;;  %v737_v19 = vadd.f32 %v736_v16, %v528_v14 }
 0x1c8   : > { %1939 = vpow2.f32 %v1317_v17  ;;  %1155 = vmax.xlane.f32.xlu0 %v2847_v63  ;;  %v864_v20 = vmax.f32 %v737_v19, 0.0 }
 0x1ca   : > { %1028 = vmatmul.f32.gmra.mxu2 %v864_v20 }
 0x1cb   : > { %v1128_v21 = vpop.xlane.xlu0 %1127  ;;  %v530_v23 = vpop.f32.mrf.mxu0 }
 0x1cc   : > { %v1254_v24 = vsub.f32 %v2722_v38, %v1128_v21  ;;  %v531_v41 = vadd.f32 %v2601_v32, %v530_v23 }
 0x1cd   : > { %v981_v13 = vpop.f32.mrf.mxu2  ;;  %v739_v26 = vpop.f32.mrf.mxu1 }
 0x1ce   : > { %v2852_v52 = vpop.eup %1939  ;;  %v1319_v29 = vmul.f32 1.442695, %v1254_v24  ;;  %v740_v28 = vadd.f32 %v739_v26, %v531_v41  ;;  %v2859_v38 = vadd.f32 %v2707_v12, %v981_v13 }
 0x1cf   : > { %1445 = vadd.xlane.f32.xlu1 %v2852_v52 }
 0x1d0   : > { %1941 = vpow2.f32 %v1319_v29  ;;  %v865_v33 = vmax.f32 %v740_v28, 0.0 }
 0x1d1   : > { %v1077_v34 = vpop.f32.mrf.mxu3 }
 0x1d2   : > { %v2856_v35 = vadd.f32 %v2707_v12, %v1077_v34  ;;  %1031 = vmatmul.f32.gmra.mxu2 %v865_v33 }
 0x1d3   : > { %v1130_v36 = vpop.xlane.xlu1 %1129  ;;  %v533_v32 = vpop.f32.mrf.mxu0 }
 0x1d4   : > { %v1255_v37 = vsub.f32 %v2731_v56, %v1130_v36  ;;  %1221 = vmax.xlane.f32.xlu0 %v2856_v35  ;;  %v534_v40 = vadd.f32 %v2866_v50, %v533_v32 }
 0x1d5   : > { %v984_v22 = vpop.f32.mrf.mxu2  ;;  %v742_v44 = vpop.f32.mrf.mxu1 }
 0x1d6   : > { %v2869_v62 = vpop.eup %1941  ;;  %v1321_v46 = vmul.f32 1.442695, %v1255_v37  ;;  %v743_v39 = vadd.f32 %v742_v44, %v534_v40  ;;  %v2875_v55 = vadd.f32 %v2707_v12, %v984_v22 }
 0x1d7   : > { %1157 = vmax.xlane.f32.xlu1 %v2859_v38  ;;  %1447 = vadd.xlane.f32.xlu2 %v2869_v62 }
 0x1d8   : > { %1943 = vpow2.f32 %v1321_v46  ;;  %v866_v56 = vmax.f32 %v743_v39, 0.0 }
 0x1d9   : > { %v1080_v48 = vpop.f32.mrf.mxu3 }
 0x1da   : > { %1034 = vmatmul.f32.gmra.mxu2 %v866_v56  ;;  %v2879_v57 = vadd.f32 %v2707_v12, %v1080_v48 }
 0x1db   : > { %v1132_v49 = vpop.xlane.xlu1 %1131  ;;  %v536_v53 = vpop.f32.mrf.mxu0 }
 0x1dc   : > { %v1256_v54 = vsub.f32 %v2740_v9, %v1132_v49  ;;  %v537_v59 = vadd.f32 %v2866_v50, %v536_v53 }
 0x1dd   : > { %v987_v31 = vpop.f32.mrf.mxu2  ;;  %v745_v60 = vpop.f32.mrf.mxu1 }
 0x1de   : > { %v2881_v8 = vpop.eup %1943  ;;  %v1323_v0 = vmul.f32 1.442695, %v1256_v54  ;;  %v746_v51 = vadd.f32 %v745_v60, %v537_v59  ;;  %v2887_v5 = vadd.f32 %v2707_v12, %v987_v31 }
 0x1df   : > { %1449 = vadd.xlane.f32.xlu0 %v2881_v8  ;;  %1223 = vmax.xlane.f32.xlu1 %v2879_v57 }
 0x1e0   : > { %1945 = vpow2.f32 %v1323_v0  ;;  %1159 = vmax.xlane.f32.xlu2 %v2875_v55  ;;  %v867_v9 = vmax.f32 %v746_v51, 0.0 }
 0x1e1   : > { %v1083_v2 = vpop.f32.mrf.mxu3 }
 0x1e2   : > { %1037 = vmatmul.f32.gmra.mxu2 %v867_v9  ;;  %v2894_v18 = vadd.f32 %v2707_v12, %v1083_v2 }
 0x1e3   : > { %v1134_v3 = vpop.xlane.xlu2 %1133  ;;  %v539_v6 = vpop.f32.mrf.mxu0 }
 0x1e4   : > { %v1257_v7 = vsub.f32 %v2749_v25, %v1134_v3  ;;  %v540_v4 = vadd.f32 %v2866_v50, %v539_v6 }
 0x1e5   : > { %v990_v10 = vpop.f32.mrf.mxu2  ;;  %v748_v42 = vpop.f32.mrf.mxu1 }
 0x1e6   : > { %v2891_v14 = vpop.eup %1945  ;;  %v1325_v16 = vmul.f32 1.442695, %v1257_v7  ;;  %v749_v17 = vadd.f32 %v748_v42, %v540_v4  ;;  %v2900_v21 = vadd.f32 %v2707_v12, %v990_v10 }
 0x1e7   : > { %1161 = vmax.xlane.f32.xlu0 %v2887_v5  ;;  %1451 = vadd.xlane.f32.xlu1 %v2891_v14 }
 0x1e8   : > { %1947 = vpow2.f32 %v1325_v16  ;;  %1225 = vmax.xlane.f32.xlu2 %v2894_v18  ;;  %v868_v19 = vmax.f32 %v749_v17, 0.0 }
 0x1e9   : > { %v1086_v25 = vpop.f32.mrf.mxu3 }
 0x1ea   : > { %1040 = vmatmul.f32.gmra.mxu2 %v868_v19  ;;  %v2905_v13 = vadd.f32 %v2707_v12, %v1086_v25 }
 0x1eb   : > { %v1136_v20 = vpop.xlane.xlu2 %1135  ;;  %v542_v23 = vpop.f32.mrf.mxu0 }
 0x1ec   : > { %v1258_v24 = vsub.f32 %v2758_v43, %v1136_v20  ;;  %v543_v41 = vadd.f32 %v2866_v50, %v542_v23 }
 0x1ed   : > { %v993_v26 = vpop.f32.mrf.mxu2  ;;  %v751_v29 = vpop.f32.mrf.mxu1 }
 0x1ee   : > { %v2907_v28 = vpop.eup %1947  ;;  %v1327_v33 = vmul.f32 1.442695, %v1258_v24  ;;  %v752_v34 = vadd.f32 %v751_v29, %v543_v41  ;;  %v2914_v22 = vadd.f32 %v2707_v12, %v993_v26 }
 0x1ef   : > { %1227 = vmax.xlane.f32.xlu0 %v2905_v13  ;;  %1163 = vmax.xlane.f32.xlu1 %v2900_v21 }
 0x1f0   : > { %1949 = vpow2.f32 %v1327_v33  ;;  %1453 = vadd.xlane.f32.xlu2 %v2907_v28  ;;  %v869_v36 = vmax.f32 %v752_v34, 0.0 }
 0x1f1   : > { %v1089_v43 = vpop.f32.mrf.mxu3 }
 0x1f2   : > { %1043 = vmatmul.f32.gmra.mxu2 %v869_v36  ;;  %v2918_v46 = vadd.f32 %v2707_v12, %v1089_v43 }
 0x1f3   : > { %v1138_v32 = vpop.xlane.xlu0 %1137  ;;  %v545_v37 = vpop.f32.mrf.mxu0 }
 0x1f4   : > { %v1259_v40 = vsub.f32 %v2767_v58, %v1138_v32  ;;  %v546_v44 = vadd.f32 %v2866_v50, %v545_v37 }
 0x1f5   : > { %v996_v39 = vpop.f32.mrf.mxu2  ;;  %v754_v56 = vpop.f32.mrf.mxu1 }
 0x1f6   : > { %v2920_v48 = vpop.eup %1949  ;;  %v1329_v49 = vmul.f32 1.442695, %v1259_v40  ;;  %v755_v53 = vadd.f32 %v754_v56, %v546_v44  ;;  %v2926_v31 = vadd.f32 %v2707_v12, %v996_v39 }
 0x1f7   : > { %1455 = vadd.xlane.f32.xlu0 %v2920_v48  ;;  %1229 = vmax.xlane.f32.xlu1 %v2918_v46 }
 0x1f8   : > { %1951 = vpow2.f32 %v1329_v49  ;;  %1165 = vmax.xlane.f32.xlu2 %v2914_v22  ;;  %v870_v58 = vmax.f32 %v755_v53, 0.0 }
 0x1f9   : > { %v1092_v54 = vpop.f32.mrf.mxu3 }
 0x1fa   : > { %1046 = vmatmul.f32.gmra.mxu2 %v870_v58  ;;  %v2933_v6 = vadd.f32 %v2707_v12, %v1092_v54 }
 0x1fb   : > { %v1140_v59 = vpop.xlane.xlu1 %1139  ;;  %v548_v60 = vpop.f32.mrf.mxu0 }
 0x1fc   : > { %v1260_v0 = vsub.f32 %v2776_v11, %v1140_v59  ;;  %v549_v51 = vadd.f32 %v2866_v50, %v548_v60 }
 0x1fd   : > { %v999_v9 = vpop.f32.mrf.mxu2  ;;  %v757_v2 = vpop.f32.mrf.mxu1 }
 0x1fe   : > { %v2930_v3 = vpop.eup %1951  ;;  %v1331_v7 = vmul.f32 1.442695, %v1260_v0  ;;  %v758_v4 = vadd.f32 %v757_v2, %v549_v51  ;;  %v2939_v16 = vadd.f32 %v2707_v12, %v999_v9 }
 0x1ff   : > { %1167 = vmax.xlane.f32.xlu0 %v2926_v31  ;;  %1457 = vadd.xlane.f32.xlu1 %v2930_v3 }
 0x200   : > { %1953 = vpow2.f32 %v1331_v7  ;;  %1231 = vmax.xlane.f32.xlu2 %v2933_v6  ;;  %v871_v10 = vmax.f32 %v758_v4, 0.0 }
 0x201   : > { %v1095_v11 = vpop.f32.mrf.mxu3 }
 0x202   : > { %1049 = vmatmul.f32.gmra.mxu2 %v871_v10  ;;  %v2944_v20 = vadd.f32 %v2707_v12, %v1095_v11 }
 0x203   : > { %v1142_v42 = vpop.xlane.xlu2 %1141  ;;  %v551_v17 = vpop.f32.mrf.mxu0 }
 0x204   : > { %v1261_v19 = vsub.f32 %v2785_v27, %v1142_v42  ;;  %v552_v25 = vadd.f32 %v2866_v50, %v551_v17 }
 0x205   : > { %v1002_v23 = vpop.f32.mrf.mxu2  ;;  %v760_v24 = vpop.f32.mrf.mxu1 }
 0x206   : > { %v2946_v41 = vpop.eup %1953  ;;  %v1333_v26 = vmul.f32 1.442695, %v1261_v19  ;;  %v761_v29 = vadd.f32 %v760_v24, %v552_v25  ;;  %v2953_v32 = vadd.f32 %v2707_v12, %v1002_v23 }
 0x207   : > { %1233 = vmax.xlane.f32.xlu0 %v2944_v20  ;;  %1169 = vmax.xlane.f32.xlu1 %v2939_v16 }
 0x208   : > { %1955 = vpow2.f32 %v1333_v26  ;;  %1459 = vadd.xlane.f32.xlu2 %v2946_v41  ;;  %v872_v33 = vmax.f32 %v761_v29, 0.0 }
 0x209   : > { %v1098_v27 = vpop.f32.mrf.mxu3 }
 0x20a   : > { %1052 = vmatmul.f32.gmra.mxu2 %v872_v33  ;;  %v2957_v40 = vadd.f32 %v2707_v12, %v1098_v27 }
 0x20b   : > { %v1144_v34 = vpop.xlane.xlu0 %1143  ;;  %v554_v36 = vpop.f32.mrf.mxu0 }
 0x20c   : > { %v1262_v43 = vsub.f32 %v2794_v45, %v1144_v34  ;;  %v555_v37 = vadd.f32 %v2866_v50, %v554_v36 }
 0x20d   : > { %v1005_v44 = vpop.f32.mrf.mxu2  ;;  %v763_v39 = vpop.f32.mrf.mxu1 }
 0x20e   : > { %v2959_v56 = vpop.eup %1955  ;;  %v1335_v49 = vmul.f32 1.442695, %v1262_v43  ;;  %v764_v53 = vadd.f32 %v763_v39, %v555_v37  ;;  %v2965_v59 = vadd.f32 %v2707_v12, %v1005_v44 }
 0x20f   : > { %1461 = vadd.xlane.f32.xlu0 %v2959_v56  ;;  %1235 = vmax.xlane.f32.xlu1 %v2957_v40 }
 0x210   : > { %1957 = vpow2.f32 %v1335_v49  ;;  %1171 = vmax.xlane.f32.xlu2 %v2953_v32  ;;  %v873_v45 = vmax.f32 %v764_v53, 0.0 }
 0x211   : > { %v1101_v58 = vpop.f32.mrf.mxu3 }
 0x212   : > { %1055 = vmatmul.f32.gmra.mxu2 %v873_v45  ;;  %v2972_v4 = vadd.f32 %v2707_v12, %v1101_v58 }
 0x213   : > { %v1146_v54 = vpop.xlane.xlu1 %1145  ;;  %v557_v60 = vpop.f32.mrf.mxu0 }
 0x214   : > { %v1263_v0 = vsub.f32 %v2803_v61, %v1146_v54  ;;  %v558_v51 = vadd.f32 %v2866_v50, %v557_v60 }
 0x215   : > { %v1008_v9 = vpop.f32.mrf.mxu2  ;;  %v766_v2 = vpop.f32.mrf.mxu1 }
 0x216   : > { %v2969_v7 = vpop.eup %1957  ;;  %v1337_v10 = vmul.f32 1.442695, %v1263_v0  ;;  %v767_v11 = vadd.f32 %v766_v2, %v558_v51  ;;  %v2978_v19 = vadd.f32 %v2707_v12, %v1008_v9 }
 0x217   : > { %1173 = vmax.xlane.f32.xlu0 %v2965_v59  ;;  %1463 = vadd.xlane.f32.xlu1 %v2969_v7 }
 0x218   : > { %1959 = vpow2.f32 %v1337_v10  ;;  %1237 = vmax.xlane.f32.xlu2 %v2972_v4  ;;  %v874_v42 = vmax.f32 %v767_v11, 0.0 }
 0x219   : > { %v1104_v61 = vpop.f32.mrf.mxu3 }
 0x21a   : > { %1058 = vmatmul.f32.gmra.mxu2 %v874_v42  ;;  %v2983_v26 = vadd.f32 %v2707_v12, %v1104_v61 }
 0x21b   : > { %v1148_v17 = vpop.xlane.xlu2 %1147  ;;  %v560_v25 = vpop.f32.mrf.mxu0 }
 0x21c   : > { %v1264_v23 = vsub.f32 %v2812_v15, %v1148_v17  ;;  %v561_v24 = vadd.f32 %v2866_v50, %v560_v25 }
 0x21d   : > { %v1011_v29 = vpop.f32.mrf.mxu2  ;;  %v769_v33 = vpop.f32.mrf.mxu1 }
 0x21e   : > { %v2985_v27 = vpop.eup %1959  ;;  %v1339_v34 = vmul.f32 1.442695, %v1264_v23  ;;  %v770_v36 = vadd.f32 %v769_v33, %v561_v24  ;;  %v2992_v49 = vadd.f32 %v2707_v12, %v1011_v29 }
 0x21f   : > { %1239 = vmax.xlane.f32.xlu0 %v2983_v26  ;;  %1175 = vmax.xlane.f32.xlu1 %v2978_v19 }
 0x220   : > { %1961 = vpow2.f32 %v1339_v34  ;;  %1465 = vadd.xlane.f32.xlu2 %v2985_v27  ;;  %v875_v43 = vmax.f32 %v770_v36, 0.0 }
 0x221   : > { %v1107_v15 = vpop.f32.mrf.mxu3 }
 0x222   : > { %1061 = vmatmul.f32.gmra.mxu2 %v875_v43  ;;  %v2996_v45 = vadd.f32 %v2707_v12, %v1107_v15  ;;  %v3019_v43 = vld [vmem:[%s3486_s4] ss:$0 sm:$0xff] }
 0x223   : > { %v1150_v37 = vpop.xlane.xlu0 %1149  ;;  %v563_v44 = vpop.f32.mrf.mxu0 }
 0x224   : > { %v1265_v39 = vsub.f32 %v2821_v30, %v1150_v37  ;;  %v564_v53 = vadd.f32 %v2866_v50, %v563_v44 }
 0x225   : > { %v1014_v58 = vpop.f32.mrf.mxu2  ;;  %v772_v54 = vpop.f32.mrf.mxu1 }
 0x226   : > { %v2998_v60 = vpop.eup %1961  ;;  %v1341_v0 = vmul.f32 1.442695, %v1265_v39  ;;  %v773_v51 = vadd.f32 %v772_v54, %v564_v53  ;;  %v3004_v10 = vadd.f32 %v2707_v12, %v1014_v58 }
 0x227   : > { %1467 = vadd.xlane.f32.xlu0 %v2998_v60  ;;  %1241 = vmax.xlane.f32.xlu1 %v2996_v45 }
 0x228   : > { %1963 = vpow2.f32 %v1341_v0  ;;  %1177 = vmax.xlane.f32.xlu2 %v2992_v49  ;;  %v876_v30 = vmax.f32 %v773_v51, 0.0 }
 0x229   : > { %v1110_v9 = vpop.f32.mrf.mxu3 }
 0x22a   : > { %1064 = vmatmul.f32.gmra.mxu2 %v876_v30  ;;  %v3011_v24 = vadd.f32 %v2707_v12, %v1110_v9 }
 0x22b   : > { %v1152_v2 = vpop.xlane.xlu1 %1151  ;;  %v566_v11 = vpop.f32.mrf.mxu0 }
 0x22c   : > { %v1266_v42 = vsub.f32 %v2830_v47, %v1152_v2  ;;  %v567_v61 = vadd.f32 %v2866_v50, %v566_v11 }
 0x22d   : > { %v1017_v17 = vpop.f32.mrf.mxu2  ;;  %v775_v25 = vpop.f32.mrf.mxu1 }
 0x22e   : > { %v3008_v23 = vpop.eup %1963  ;;  %v1343_v29 = vmul.f32 1.442695, %v1266_v42  ;;  %v776_v33 = vadd.f32 %v775_v25, %v567_v61  ;;  %v3022_v12 = vadd.f32 %v3019_v43, %v1017_v17 }
 0x22f   : > { %1179 = vmax.xlane.f32.xlu0 %v3004_v10  ;;  %1469 = vadd.xlane.f32.xlu1 %v3008_v23 }
 0x230   : > { %1965 = vpow2.f32 %v1343_v29  ;;  %1243 = vmax.xlane.f32.xlu2 %v3011_v24  ;;  %v877_v34 = vmax.f32 %v776_v33, 0.0 }
 0x231   : > { %v1113_v47 = vpop.f32.mrf.mxu3 }
 0x232   : > { %1067 = vmatmul.f32.gmra.mxu2 %v877_v34  ;;  %v3027_v39 = vadd.f32 %v3019_v43, %v1113_v47 }
 0x233   : > { %v1154_v36 = vpop.xlane.xlu2 %1153  ;;  %v569_v15 = vpop.f32.mrf.mxu0 }
 0x234   : > { %v1267_v37 = vsub.f32 %v2839_v1, %v1154_v36  ;;  %v570_v44 = vadd.f32 %v2866_v50, %v569_v15 }
 0x235   : > { %v1020_v53 = vpop.f32.mrf.mxu2  ;;  %v778_v58 = vpop.f32.mrf.mxu1 }
 0x236   : > { %v3029_v54 = vpop.eup %1965  ;;  %v1345_v0 = vmul.f32 1.442695, %v1267_v37  ;;  %v779_v51 = vadd.f32 %v778_v58, %v570_v44  ;;  %v3038_v42 = vadd.f32 %v3019_v43, %v1020_v53 }
 0x237   : > { %1245 = vmax.xlane.f32.xlu0 %v3027_v39  ;;  %1181 = vmax.xlane.f32.xlu1 %v3022_v12 }
 0x238   : > { %1967 = vpow2.f32 %v1345_v0  ;;  %1471 = vadd.xlane.f32.xlu2 %v3029_v54  ;;  %v878_v1 = vmax.f32 %v779_v51, 0.0 }
 0x239   : > { %v1116_v30 = vpop.f32.mrf.mxu3 }
 0x23a   : > { %1070 = vmatmul.f32.gmra.mxu2 %v878_v1  ;;  %v3042_v17 = vadd.f32 %v3019_v43, %v1116_v30 }
 0x23b   : > { %v1156_v9 = vpop.xlane.xlu0 %1155  ;;  %v572_v2 = vpop.f32.mrf.mxu0 }
 0x23c   : > { %v1268_v11 = vsub.f32 %v2847_v63, %v1156_v9  ;;  %v573_v61 = vadd.f32 %v2866_v50, %v572_v2 }
 0x23d   : > { %v1023_v25 = vpop.f32.mrf.mxu2  ;;  %v781_v29 = vpop.f32.mrf.mxu1 }
 0x23e   : > { %v3044_v33 = vpop.eup %1967  ;;  %v1347_v34 = vmul.f32 1.442695, %v1268_v11  ;;  %v782_v47 = vadd.f32 %v781_v29, %v573_v61  ;;  %v3050_v15 = vadd.f32 %v3019_v43, %v1023_v25 }
 0x23f   : > { %1473 = vadd.xlane.f32.xlu0 %v3044_v33  ;;  %1247 = vmax.xlane.f32.xlu1 %v3042_v17 }
 0x240   : > { %1969 = vpow2.f32 %v1347_v34  ;;  %1183 = vmax.xlane.f32.xlu2 %v3038_v42  ;;  %v879_v63 = vmax.f32 %v782_v47, 0.0 }
 0x241   : > { %v1119_v36 = vpop.f32.mrf.mxu3 }
 0x242   : > { %v1446_v50 = vpop.xlane.xlu1 %1445  ;;  %1073 = vmatmul.f32.gmra.mxu2 %v879_v63  ;;  %v3055_v53 = vadd.f32 %v3019_v43, %v1119_v36 }
 0x243   : > { %1971 = vrcp.f32 %v1446_v50 }
 0x245   : > { %v1026_v37 = vpop.f32.mrf.mxu2 }
 0x246   : > { %v3052_v44 = vpop.eup %1969  ;;  %v3069_v61 = vadd.f32 %v3019_v43, %v1026_v37 }
 0x247   : > { %1185 = vmax.xlane.f32.xlu0 %v3050_v15  ;;  %1475 = vadd.xlane.f32.xlu1 %v3052_v44  ;;  %v1222_v58 = vpop.xlane.xlu0 %1221 }
 0x248   : > { %1249 = vmax.xlane.f32.xlu2 %v3055_v53  ;;  %v1301_v0 = vsub.f32 %v2856_v35, %v1222_v58 }
 0x249   : > { %v1972_v51 = vpop.eup %1971  ;;  %v1122_v1 = vpop.f32.mrf.mxu3 }
 0x24a   : > { %v1637_v30 = vmul.f32 %v1972_v51, %v2852_v52  ;;  %v1158_v9 = vpop.xlane.xlu1 %1157  ;;  %v1448_v2 = vpop.xlane.xlu2 %1447  ;;  %v1413_v35 = vmul.f32 1.442695, %v1301_v0  ;;  %v3073_v25 = vadd.f32 %v3019_v43, %v1122_v1 }
 0x24b   : > { %v1269_v11 = vsub.f32 %v2859_v38, %v1158_v9  ;;  %1973 = vrcp.f32 %v1448_v2 }
 0x24c   : > { %1701 = vst [vmem:[%s3064_s6] sm:$0xff] %v1637_v30 }
 0x24d   : > { %v1349_v29 = vmul.f32 1.442695, %v1269_v11  ;;  %v1029_v34 = vpop.f32.mrf.mxu2 }
 0x24e   : > { %v3089_v11 = vadd.f32 %v3019_v43, %v1029_v34 }
 0x24f   : > { %1975 = vpow2.f32 %v1349_v29  ;;  %1251 = vmax.xlane.f32.xlu0 %v3073_v25  ;;  %1187 = vmax.xlane.f32.xlu1 %v3069_v61 }
 0x250   : > { %1977 = vpow2.f32 %v1413_v35 }
 0x251   : > { %v1974_v52 = vpop.eup %1973 }
 0x252   : > { %v1638_v38 = vmul.f32 %v1974_v52, %v2869_v62  ;;  %v1224_v47 = vpop.xlane.xlu1 %1223  ;;  %v1450_v63 = vpop.xlane.xlu0 %1449 }
 0x253   : > { %v1160_v36 = vpop.xlane.xlu2 %1159  ;;  %1979 = vrcp.f32 %v1450_v63  ;;  %v1302_v51 = vsub.f32 %v2879_v57, %v1224_v47 }
 0x254   : > { %1702 = vst [vmem:[%s3064_s6 + $0x8] sm:$0xff] %v1638_v38  ;;  %v1270_v50 = vsub.f32 %v2875_v55, %v1160_v36 }
 0x255   : > { %v3080_v37 = vpop.eup %1975  ;;  %v1032_v58 = vpop.f32.mrf.mxu2  ;;  %v1415_v30 = vmul.f32 1.442695, %v1302_v51 }
 0x256   : > { %v3082_v0 = vpop.eup %1977  ;;  %v1351_v1 = vmul.f32 1.442695, %v1270_v50  ;;  %1477 = vadd.xlane.f32.xlu2 %v3080_v37  ;;  %v3101_v51 = vadd.f32 %v3019_v43, %v1032_v58 }
 0x257   : > { %1541 = vadd.xlane.f32.xlu1 %v3082_v0 }
 0x258   : > { %1981 = vpow2.f32 %v1351_v1 }
 0x259   : > { %v1980_v62 = vpop.eup %1979 }
 0x25a   : > { %v1639_v9 = vmul.f32 %v1980_v62, %v2881_v8  ;;  %v1452_v2 = vpop.xlane.xlu1 %1451  ;;  %v1162_v55 = vpop.xlane.xlu0 %1161 }
 0x25b   : > { %1983 = vrcp.f32 %v1452_v2  ;;  %v1226_v35 = vpop.xlane.xlu2 %1225  ;;  %v1271_v29 = vsub.f32 %v2887_v5, %v1162_v55 }
 0x25c   : > { %1703 = vst [vmem:[%s3064_s6 + $0x10] sm:$0xff] %v1639_v9  ;;  %1985 = vpow2.f32 %v1415_v30  ;;  %v1303_v8 = vsub.f32 %v2894_v18, %v1226_v35 }
 0x25d   : > { %v1353_v57 = vmul.f32 1.442695, %v1271_v29  ;;  %v1035_v52 = vpop.f32.mrf.mxu2 }
 0x25e   : > { %v3093_v38 = vpop.eup %1981  ;;  %1189 = vmax.xlane.f32.xlu2 %v3089_v11  ;;  %v1417_v62 = vmul.f32 1.442695, %v1303_v8  ;;  %v3113_v55 = vadd.f32 %v3019_v43, %v1035_v52 }
 0x25f   : > { %1987 = vpow2.f32 %v1353_v57  ;;  %1479 = vadd.xlane.f32.xlu0 %v3093_v38 }
 0x261   : > { %v1984_v34 = vpop.eup %1983 }
 0x262   : > { %v1640_v47 = vmul.f32 %v1984_v34, %v2891_v14  ;;  %v1164_v63 = vpop.xlane.xlu1 %1163  ;;  %v1228_v36 = vpop.xlane.xlu0 %1227 }
 0x263   : > { %v1272_v5 = vsub.f32 %v2900_v21, %v1164_v63  ;;  %v1454_v50 = vpop.xlane.xlu2 %1453  ;;  %v3103_v1 = vpop.eup %1985  ;;  %v1304_v14 = vsub.f32 %v2905_v13, %v1228_v36 }
 0x264   : > { %1704 = vst [vmem:[%s3064_s6 + $0x18] sm:$0xff] %v1640_v47  ;;  %1989 = vrcp.f32 %v1454_v50 }
 0x265   : > { %v3106_v30 = vpop.eup %1987  ;;  %v1355_v9 = vmul.f32 1.442695, %v1272_v5  ;;  %v1038_v18 = vpop.f32.mrf.mxu2  ;;  %v1419_v29 = vmul.f32 1.442695, %v1304_v14 }
 0x266   : > { %1543 = vadd.xlane.f32.xlu2 %v3103_v1  ;;  %1481 = vadd.xlane.f32.xlu1 %v3106_v30 }
 0x267   : > { %1991 = vpow2.f32 %v1355_v9  ;;  %1191 = vmax.xlane.f32.xlu0 %v3101_v51 }
 0x268   : > { %1993 = vpow2.f32 %v1417_v62  ;;  %v3128_v62 = vadd.f32 %v3019_v43, %v1038_v18 }
 0x26a   : > { %v1990_v21 = vpop.eup %1989  ;;  %v1230_v58 = vpop.xlane.xlu1 %1229 }
 0x26b   : > { %v1456_v2 = vpop.xlane.xlu0 %1455  ;;  %v1641_v35 = vmul.f32 %v1990_v21, %v2907_v28  ;;  %v1166_v57 = vpop.xlane.xlu2 %1165  ;;  %v1305_v63 = vsub.f32 %v2918_v46, %v1230_v58 }
 0x26c   : > { %1995 = vrcp.f32 %v1456_v2  ;;  %v1273_v8 = vsub.f32 %v2914_v22, %v1166_v57 }
 0x26d   : > { %v3117_v34 = vpop.eup %1991  ;;  %1705 = vst [vmem:[%s3064_s6 + $0x20] sm:$0xff] %v1641_v35  ;;  %v1041_v13 = vpop.f32.mrf.mxu2  ;;  %1997 = vpow2.f32 %v1419_v29  ;;  %v1421_v22 = vmul.f32 1.442695, %v1305_v63 }
 0x26e   : > { %v3120_v47 = vpop.eup %1993  ;;  %v1357_v36 = vmul.f32 1.442695, %v1273_v8  ;;  %1483 = vadd.xlane.f32.xlu2 %v3117_v34  ;;  %1193 = vmax.xlane.f32.xlu1 %v3113_v55  ;;  %v3143_v63 = vadd.f32 %v3019_v43, %v1041_v13 }
 0x26f   : > { %1545 = vadd.xlane.f32.xlu0 %v3120_v47 }
 0x270   : > { %1999 = vpow2.f32 %v1357_v36 }
 0x272   : > { %v1996_v28 = vpop.eup %1995  ;;  %v1458_v5 = vpop.xlane.xlu1 %1457 }
 0x273   : > { %v1642_v52 = vmul.f32 %v1996_v28, %v2920_v48  ;;  %v1168_v50 = vpop.xlane.xlu0 %1167  ;;  %v1232_v46 = vpop.xlane.xlu2 %1231  ;;  %2001 = vrcp.f32 %v1458_v5 }
 0x274   : > { %v1274_v9 = vsub.f32 %v2926_v31, %v1168_v50  ;;  %v3132_v14 = vpop.eup %1997  ;;  %2003 = vpow2.f32 %v1421_v22  ;;  %v1306_v48 = vsub.f32 %v2933_v6, %v1232_v46 }
 0x275   : > { %1706 = vst [vmem:[%s3064_s6 + $0x28] sm:$0xff] %v1642_v52  ;;  %v1044_v58 = vpop.f32.mrf.mxu2 }
 0x276   : > { %v1359_v21 = vmul.f32 1.442695, %v1274_v9  ;;  %v3134_v2 = vpop.eup %1999  ;;  %1195 = vmax.xlane.f32.xlu2 %v3128_v62  ;;  %1547 = vadd.xlane.f32.xlu1 %v3132_v14  ;;  %v1423_v28 = vmul.f32 1.442695, %v1306_v48  ;;  %v3155_v50 = vadd.f32 %v3019_v43, %v1044_v58 }
 0x277   : > { %1485 = vadd.xlane.f32.xlu0 %v3134_v2 }
 0x278   : > { %2005 = vpow2.f32 %v1359_v21 }
 0x279   : > { %v2002_v18 = vpop.eup %2001 }
 0x27a   : > { %v1643_v31 = vmul.f32 %v2002_v18, %v2930_v3  ;;  %v1170_v35 = vpop.xlane.xlu1 %1169  ;;  %v3145_v36 = vpop.eup %2003 }
 0x27b   : > { %v1234_v29 = vpop.xlane.xlu0 %1233  ;;  %v1460_v57 = vpop.xlane.xlu2 %1459  ;;  %v1275_v8 = vsub.f32 %v2939_v16, %v1170_v35 }
 0x27c   : > { %1707 = vst [vmem:[%s3064_s6 + $0x30] sm:$0xff] %v1643_v31  ;;  %2007 = vrcp.f32 %v1460_v57  ;;  %v1307_v3 = vsub.f32 %v2944_v20, %v1234_v29 }
 0x27d   : > { %v1361_v52 = vmul.f32 1.442695, %v1275_v8  ;;  %v1047_v6 = vpop.f32.mrf.mxu2 }
 0x27e   : > { %v3148_v22 = vpop.eup %2005  ;;  %1549 = vadd.xlane.f32.xlu2 %v3145_v36  ;;  %v1425_v9 = vmul.f32 1.442695, %v1307_v3 }
 0x27f   : > { %1487 = vadd.xlane.f32.xlu1 %v3148_v22  ;;  %2009 = vpow2.f32 %v1361_v52  ;;  %1197 = vmax.xlane.f32.xlu0 %v3143_v63 }
 0x280   : > { %2011 = vpow2.f32 %v1423_v28  ;;  %v3170_v28 = vadd.f32 %v3019_v43, %v1047_v6 }
 0x282   : > { %v2008_v16 = vpop.eup %2007  ;;  %v1236_v13 = vpop.xlane.xlu1 %1235 }
 0x283   : > { %v1462_v5 = vpop.xlane.xlu0 %1461  ;;  %v1644_v46 = vmul.f32 %v2008_v16, %v2946_v41  ;;  %v1172_v21 = vpop.xlane.xlu2 %1171  ;;  %v1308_v29 = vsub.f32 %v2957_v40, %v1236_v13 }
 0x284   : > { %2013 = vrcp.f32 %v1462_v5  ;;  %v1276_v48 = vsub.f32 %v2953_v32, %v1172_v21 }
 0x285   : > { %v3159_v18 = vpop.eup %2009  ;;  %1708 = vst [vmem:[%s3064_s6 + $0x38] sm:$0xff] %v1644_v46  ;;  %v1050_v20 = vpop.f32.mrf.mxu2  ;;  %2015 = vpow2.f32 %v1425_v9  ;;  %v1427_v32 = vmul.f32 1.442695, %v1308_v29 }
 0x286   : > { %v3162_v31 = vpop.eup %2011  ;;  %v1363_v35 = vmul.f32 1.442695, %v1276_v48  ;;  %1489 = vadd.xlane.f32.xlu2 %v3159_v18 }
 0x287   : > { %1199 = vmax.xlane.f32.xlu1 %v3155_v50  ;;  %1551 = vadd.xlane.f32.xlu0 %v3162_v31 }
 0x288   : > { %2017 = vpow2.f32 %v1363_v35  ;;  %v3185_v35 = vadd.f32 %v3019_v43, %v1050_v20 }
 0x28a   : > { %v2014_v41 = vpop.eup %2013  ;;  %v1464_v57 = vpop.xlane.xlu1 %1463 }
 0x28b   : > { %v1645_v58 = vmul.f32 %v2014_v41, %v2959_v56  ;;  %v1174_v8 = vpop.xlane.xlu0 %1173  ;;  %v1238_v52 = vpop.xlane.xlu2 %1237  ;;  %2019 = vrcp.f32 %v1464_v57 }
 0x28c   : > { %v1277_v40 = vsub.f32 %v2965_v59, %v1174_v8  ;;  %v3174_v3 = vpop.eup %2015  ;;  %2021 = vpow2.f32 %v1427_v32  ;;  %v1309_v56 = vsub.f32 %v2972_v4, %v1238_v52 }
 0x28d   : > { %1709 = vst [vmem:[%s3064_s6 + $0x40] sm:$0xff] %v1645_v58  ;;  %v1053_v13 = vpop.f32.mrf.mxu2 }
 0x28e   : > { %v1365_v16 = vmul.f32 1.442695, %v1277_v40  ;;  %v3176_v5 = vpop.eup %2017  ;;  %1201 = vmax.xlane.f32.xlu2 %v3170_v28  ;;  %v1429_v41 = vmul.f32 1.442695, %v1309_v56  ;;  %v3199_v8 = vadd.f32 %v3019_v43, %v1053_v13 }
 0x28f   : > { %1553 = vadd.xlane.f32.xlu1 %v3174_v3  ;;  %1491 = vadd.xlane.f32.xlu0 %v3176_v5 }
 0x290   : > { %2023 = vpow2.f32 %v1365_v16 }
 0x291   : > { %v2020_v6 = vpop.eup %2019 }
 0x292   : > { %v1646_v59 = vmul.f32 %v2020_v6, %v2969_v7  ;;  %v1176_v46 = vpop.xlane.xlu1 %1175  ;;  %v3187_v29 = vpop.eup %2021 }
 0x293   : > { %v1240_v9 = vpop.xlane.xlu0 %1239  ;;  %v1466_v21 = vpop.xlane.xlu2 %1465  ;;  %v1278_v48 = vsub.f32 %v2978_v19, %v1176_v46 }
 0x294   : > { %1710 = vst [vmem:[%s3064_s6 + $0x48] sm:$0xff] %v1646_v59  ;;  %2025 = vrcp.f32 %v1466_v21  ;;  %v1310_v7 = vsub.f32 %v2983_v26, %v1240_v9 }
 0x295   : > { %v1367_v58 = vmul.f32 1.442695, %v1278_v48  ;;  %v1056_v4 = vpop.f32.mrf.mxu2 }
 0x296   : > { %v3190_v32 = vpop.eup %2023  ;;  %1555 = vadd.xlane.f32.xlu2 %v3187_v29  ;;  %v1431_v40 = vmul.f32 1.442695, %v1310_v7  ;;  %v3213_v21 = vadd.f32 %v3019_v43, %v1056_v4 }
 0x297   : > { %1493 = vadd.xlane.f32.xlu1 %v3190_v32  ;;  %2027 = vpow2.f32 %v1367_v58  ;;  %1203 = vmax.xlane.f32.xlu0 %v3185_v35 }
 0x298   : > { %2029 = vpow2.f32 %v1429_v41 }
 0x29a   : > { %v2026_v19 = vpop.eup %2025  ;;  %v3196_v20 = vpop.xlane.xlu1 %1241 }
 0x29b   : > { %v1468_v57 = vpop.xlane.xlu0 %1467  ;;  %v1647_v52 = vmul.f32 %v2026_v19, %v2985_v27  ;;  %v1178_v16 = vpop.xlane.xlu2 %1177 }
 0x29c   : > { %2031 = vrcp.f32 %v1468_v57  ;;  %v1279_v56 = vsub.f32 %v2992_v49, %v1178_v16 }
 0x29d   : > { %v3203_v6 = vpop.eup %2027  ;;  %1711 = vst [vmem:[%s3064_s6 + $0x50] sm:$0xff] %v1647_v52  ;;  %v1059_v26 = vpop.f32.mrf.mxu2  ;;  %2033 = vpow2.f32 %v1431_v40 }
 0x29e   : > { %v3206_v59 = vpop.eup %2029  ;;  %v1369_v46 = vmul.f32 1.442695, %v1279_v56  ;;  %1495 = vadd.xlane.f32.xlu2 %v3203_v6  ;;  %v3227_v56 = vadd.f32 %v3019_v43, %v1059_v26 }
 0x29f   : > { %1205 = vmax.xlane.f32.xlu1 %v3199_v8  ;;  %1557 = vadd.xlane.f32.xlu0 %v3206_v59 }
 0x2a0   : > { %2035 = vpow2.f32 %v1369_v46 }
 0x2a2   : > { %v2032_v27 = vpop.eup %2031  ;;  %v1470_v49 = vpop.xlane.xlu1 %1469 }
 0x2a3   : > { %v1648_v13 = vmul.f32 %v2032_v27, %v2998_v60  ;;  %v1180_v9 = vpop.xlane.xlu0 %1179  ;;  %v1244_v48 = vpop.xlane.xlu2 %1243  ;;  %2037 = vrcp.f32 %v1470_v49 }
 0x2a4   : > { %v1280_v41 = vsub.f32 %v3004_v10, %v1180_v9  ;;  %v3217_v58 = vpop.eup %2033 }
 0x2a5   : > { %1712 = vst [vmem:[%s3064_s6 + $0x58] sm:$0xff] %v1648_v13  ;;  %v1062_v60 = vpop.f32.mrf.mxu2 }
 0x2a6   : > { %v1371_v7 = vmul.f32 1.442695, %v1280_v41  ;;  %v3219_v19 = vpop.eup %2035  ;;  %1207 = vmax.xlane.f32.xlu2 %v3213_v21 }
 0x2a7   : > { %1559 = vadd.xlane.f32.xlu1 %v3217_v58  ;;  %1497 = vadd.xlane.f32.xlu0 %v3219_v19 }
 0x2a8   : > { %2039 = vpow2.f32 %v1371_v7 }
 0x2a9   : > { %v2038_v4 = vpop.eup %2037 }
 0x2aa   : > { %v1649_v57 = vmul.f32 %v2038_v4, %v3008_v23  ;;  %v1182_v52 = vpop.xlane.xlu1 %1181 }
 0x2ab   : > { %v1246_v10 = vpop.xlane.xlu0 %1245  ;;  %v1472_v40 = vpop.xlane.xlu2 %1471  ;;  %v1281_v16 = vsub.f32 %v3022_v12, %v1182_v52  ;;  %v3237_v12 = vadd.f32 %v3019_v43, %v1062_v60 }
 0x2ac   : > { %1713 = vst [vmem:[%s3064_s6 + $0x60] sm:$0xff] %v1649_v57  ;;  %2041 = vrcp.f32 %v1472_v40 }
 0x2ad   : > { %v1373_v27 = vmul.f32 1.442695, %v1281_v16  ;;  %v1065_v23 = vpop.f32.mrf.mxu2 }
 0x2ae   : > { %v3230_v46 = vpop.eup %2039 }
 0x2af   : > { %1499 = vadd.xlane.f32.xlu1 %v3230_v46  ;;  %2043 = vpow2.f32 %v1373_v27  ;;  %1209 = vmax.xlane.f32.xlu0 %v3227_v56 }
 0x2b2   : > { %v2042_v13 = vpop.eup %2041  ;;  %v3234_v49 = vpop.xlane.xlu1 %1247 }
 0x2b3   : > { %v1474_v9 = vpop.xlane.xlu0 %1473  ;;  %v1650_v26 = vmul.f32 %v2042_v13, %v3029_v54  ;;  %v1184_v41 = vpop.xlane.xlu2 %1183  ;;  %v3248_v54 = vadd.f32 %v3019_v43, %v1065_v23 }
 0x2b4   : > { %2045 = vrcp.f32 %v1474_v9  ;;  %v1282_v7 = vsub.f32 %v3038_v42, %v1184_v41 }
 0x2b5   : > { %v3241_v4 = vpop.eup %2043  ;;  %1714 = vst [vmem:[%s3064_s6 + $0x68] sm:$0xff] %v1650_v26  ;;  %v1068_v27 = vpop.f32.mrf.mxu2 }
 0x2b6   : > { %v1375_v57 = vmul.f32 1.442695, %v1282_v7  ;;  %1501 = vadd.xlane.f32.xlu2 %v3241_v4 }
 0x2b7   : > { %1211 = vmax.xlane.f32.xlu1 %v3237_v12 }
 0x2b8   : > { %2047 = vpow2.f32 %v1375_v57  ;;  %v3262_v57 = vadd.f32 %v3019_v43, %v1068_v27 }
 0x2ba   : > { %v2046_v52 = vpop.eup %2045  ;;  %v1476_v40 = vpop.xlane.xlu1 %1475 }
 0x2bb   : > { %v1651_v60 = vmul.f32 %v2046_v52, %v3044_v33  ;;  %v1186_v16 = vpop.xlane.xlu0 %1185  ;;  %2049 = vrcp.f32 %v1476_v40  ;;  %v1312_v33 = vsub.f32 %v3011_v24, %v1244_v48  ;;  %v3257_v41 = vpop.xlane.xlu2 %1249  ;;  %v1313_v24 = vsub.f32 %v3027_v39, %v1246_v10 }
 0x2bc   : > { %v1283_v42 = vsub.f32 %v3050_v15, %v1186_v16  ;;  %v1311_v39 = vsub.f32 %v2996_v45, %v3196_v20 }
 0x2bd   : > { %1715 = vst [vmem:[%s3064_s6 + $0x70] sm:$0xff] %v1651_v60  ;;  %v1435_v52 = vmul.f32 1.442695, %v1312_v33  ;;  %v1071_v16 = vpop.f32.mrf.mxu2  ;;  %v1437_v27 = vmul.f32 1.442695, %v1313_v24 }
 0x2be   : > { %v1377_v13 = vmul.f32 1.442695, %v1283_v42  ;;  %v3252_v9 = vpop.eup %2047  ;;  %1213 = vmax.xlane.f32.xlu2 %v3248_v54  ;;  %v3273_v42 = vadd.f32 %v3019_v43, %v1071_v16 }
 0x2bf   : > { %1503 = vadd.xlane.f32.xlu0 %v3252_v9 }
 0x2c0   : > { %2051 = vpow2.f32 %v1377_v13 }
 0x2c1   : > { %v2050_v26 = vpop.eup %2049 }
 0x2c2   : > { %v1652_v23 = vmul.f32 %v2050_v26, %v3052_v44  ;;  %v1188_v7 = vpop.xlane.xlu1 %1187 }
 0x2c3   : > { %v1284_v15 = vsub.f32 %v3069_v61, %v1188_v7  ;;  %v3270_v48 = vpop.xlane.xlu0 %1251 }
 0x2c4   : > { %1716 = vst [vmem:[%s3064_s6 + $0x78] sm:$0xff] %v1652_v23 }
 0x2c5   : > { %v1379_v40 = vmul.f32 1.442695, %v1284_v15  ;;  %v1074_v10 = vpop.f32.mrf.mxu2 }
 0x2c6   : > { %v3265_v60 = vpop.eup %2051  ;;  %v3288_v24 = vadd.f32 %v3019_v43, %v1074_v10 }
 0x2c7   : > { %1505 = vadd.xlane.f32.xlu1 %v3265_v60  ;;  %2053 = vpow2.f32 %v1379_v40  ;;  %1215 = vmax.xlane.f32.xlu0 %v3262_v57 }
 0x2c8   : > { %2055 = vpow2.f32 %v1435_v52 }
 0x2c9   : > { %v1478_v44 = vpop.xlane.xlu2 %1477 }
 0x2ca   : > { %2057 = vrcp.f32 %v1478_v44  ;;  %v1542_v61 = vpop.xlane.xlu1 %1541  ;;  %v1433_v44 = vmul.f32 1.442695, %v1311_v39 }
 0x2cb   : > { %2059 = vrcp.f32 %v1542_v61 }
 0x2cc   : > { %2061 = vpow2.f32 %v1437_v27 }
 0x2cd   : > { %v3275_v13 = vpop.eup %2053 }
 0x2ce   : > { %v3277_v33 = vpop.eup %2055  ;;  %1507 = vadd.xlane.f32.xlu2 %v3275_v13 }
 0x2cf   : > { %1217 = vmax.xlane.f32.xlu1 %v3273_v42  ;;  %1563 = vadd.xlane.f32.xlu0 %v3277_v33 }
 0x2d0   : > { %v2058_v26 = vpop.eup %2057 }
 0x2d1   : > { %v2060_v23 = vpop.eup %2059  ;;  %v1653_v7 = vmul.f32 %v2058_v26, %v3080_v37  ;;  %v1190_v15 = vpop.xlane.xlu2 %1189 }
 0x2d2   : > { %v1685_v52 = vmul.f32 %v2060_v23, %v3082_v0  ;;  %v1285_v40 = vsub.f32 %v3089_v11, %v1190_v15  ;;  %v1480_v16 = vpop.xlane.xlu0 %1479  ;;  %v3292_v20 = vpop.eup %2061 }
 0x2d3   : > { %1717 = vst [vmem:[%s3064_s6 + $0x80] sm:$0xff] %v1653_v7  ;;  %2063 = vrcp.f32 %v1480_v16 }
 0x2d4   : > { %1749 = vst [vmem:[%s3064_s6 + $0x180] sm:$0xff] %v1685_v52  ;;  %v1381_v45 = vmul.f32 1.442695, %v1285_v40 }
 0x2d6   : > { %2065 = vpow2.f32 %v1381_v45  ;;  %1219 = vmax.xlane.f32.xlu2 %v3288_v24 }
 0x2d7   : > { %1565 = vadd.xlane.f32.xlu1 %v3292_v20  ;;  %2067 = vpow2.f32 %v1433_v44 }
 0x2d9   : > { %v2064_v37 = vpop.eup %2063  ;;  %v1544_v0 = vpop.xlane.xlu2 %1543 }
 0x2da   : > { %v1482_v11 = vpop.xlane.xlu1 %1481  ;;  %v1654_v43 = vmul.f32 %v2064_v37, %v3093_v38  ;;  %2069 = vrcp.f32 %v1544_v0  ;;  %v1192_v61 = vpop.xlane.xlu0 %1191 }
 0x2db   : > { %2071 = vrcp.f32 %v1482_v11  ;;  %v1286_v27 = vsub.f32 %v3101_v51, %v1192_v61 }
 0x2dc   : > { %v3298_v39 = vpop.eup %2065  ;;  %1718 = vst [vmem:[%s3064_s6 + $0x88] sm:$0xff] %v1654_v43 }
 0x2dd   : > { %v3301_v10 = vpop.eup %2067  ;;  %v1383_v26 = vmul.f32 1.442695, %v1286_v27  ;;  %1509 = vadd.xlane.f32.xlu0 %v3298_v39 }
 0x2de   : > { %1561 = vadd.xlane.f32.xlu2 %v3301_v10 }
 0x2df   : > { %2073 = vpow2.f32 %v1383_v26 }
 0x2e0   : > { %v2070_v23 = vpop.eup %2069 }
 0x2e1   : > { %v2072_v38 = vpop.eup %2071  ;;  %v1686_v7 = vmul.f32 %v2070_v23, %v3103_v1  ;;  %v1484_v15 = vpop.xlane.xlu2 %1483 }
 0x2e2   : > { %v1194_v52 = vpop.xlane.xlu1 %1193  ;;  %v1655_v51 = vmul.f32 %v2072_v38, %v3106_v30  ;;  %2075 = vrcp.f32 %v1484_v15  ;;  %v1546_v16 = vpop.xlane.xlu0 %1545 }
 0x2e3   : > { %v1287_v40 = vsub.f32 %v3113_v55, %v1194_v52  ;;  %1750 = vst [vmem:[%s3064_s6 + $0x188] sm:$0xff] %v1686_v7  ;;  %2077 = vrcp.f32 %v1546_v16 }
 0x2e4   : > { %1719 = vst [vmem:[%s3064_s6 + $0x90] sm:$0xff] %v1655_v51 }
 0x2e5   : > { %v1385_v44 = vmul.f32 1.442695, %v1287_v40  ;;  %v3310_v45 = vpop.eup %2073 }
 0x2e6   : > { %1511 = vadd.xlane.f32.xlu1 %v3310_v45 }
 0x2e7   : > { %2079 = vpow2.f32 %v1385_v44 }
 0x2e8   : > { %v2076_v1 = vpop.eup %2075 }
 0x2e9   : > { %v2078_v37 = vpop.eup %2077  ;;  %v1656_v0 = vmul.f32 %v2076_v1, %v3117_v34  ;;  %v1196_v30 = vpop.xlane.xlu2 %1195 }
 0x2ea   : > { %v1548_v11 = vpop.xlane.xlu1 %1547  ;;  %v1687_v55 = vmul.f32 %v2078_v37, %v3120_v47  ;;  %v1288_v43 = vsub.f32 %v3128_v62, %v1196_v30  ;;  %v1486_v61 = vpop.xlane.xlu0 %1485 }
 0x2eb   : > { %2081 = vrcp.f32 %v1548_v11  ;;  %1720 = vst [vmem:[%s3064_s6 + $0x98] sm:$0xff] %v1656_v0 }
 0x2ec   : > { %2083 = vrcp.f32 %v1486_v61  ;;  %1751 = vst [vmem:[%s3064_s6 + $0x190] sm:$0xff] %v1687_v55  ;;  %v1387_v26 = vmul.f32 1.442695, %v1288_v43 }
 0x2ed   : > { %v3317_v27 = vpop.eup %2079 }
 0x2ee   : > { %1513 = vadd.xlane.f32.xlu2 %v3317_v27  ;;  %2085 = vpow2.f32 %v1387_v26 }
 0x2f1   : > { %v2082_v34 = vpop.eup %2081  ;;  %v1550_v47 = vpop.xlane.xlu2 %1549 }
 0x2f2   : > { %v2084_v23 = vpop.eup %2083  ;;  %v1688_v38 = vmul.f32 %v2082_v34, %v3132_v14  ;;  %v1488_v7 = vpop.xlane.xlu1 %1487  ;;  %2087 = vrcp.f32 %v1550_v47 }
 0x2f3   : > { %v1657_v62 = vmul.f32 %v2084_v23, %v3134_v2  ;;  %v1198_v15 = vpop.xlane.xlu0 %1197  ;;  %2089 = vrcp.f32 %v1488_v7 }
 0x2f4   : > { %1752 = vst [vmem:[%s3064_s6 + $0x198] sm:$0xff] %v1688_v38  ;;  %v1289_v52 = vsub.f32 %v3143_v63, %v1198_v15  ;;  %v3325_v51 = vpop.eup %2085 }
 0x2f5   : > { %1721 = vst [vmem:[%s3064_s6 + $0xa0] sm:$0xff] %v1657_v62  ;;  %1515 = vadd.xlane.f32.xlu0 %v3325_v51 }
 0x2f6   : > { %v1389_v40 = vmul.f32 1.442695, %v1289_v52 }
 0x2f8   : > { %2091 = vpow2.f32 %v1389_v40  ;;  %v2088_v14 = vpop.eup %2087 }
 0x2f9   : > { %v2090_v16 = vpop.eup %2089  ;;  %v1689_v44 = vmul.f32 %v2088_v14, %v3145_v36  ;;  %v1490_v2 = vpop.xlane.xlu2 %1489 }
 0x2fa   : > { %v1200_v1 = vpop.xlane.xlu1 %1199  ;;  %v1658_v37 = vmul.f32 %v2090_v16, %v3148_v22  ;;  %2093 = vrcp.f32 %v1490_v2 }
 0x2fb   : > { %v1290_v0 = vsub.f32 %v3155_v50, %v1200_v1  ;;  %v1552_v63 = vpop.xlane.xlu0 %1551  ;;  %1753 = vst [vmem:[%s3064_s6 + $0x1a0] sm:$0xff] %v1689_v44 }
 0x2fc   : > { %2095 = vrcp.f32 %v1552_v63  ;;  %1722 = vst [vmem:[%s3064_s6 + $0xa8] sm:$0xff] %v1658_v37 }
 0x2fd   : > { %v1391_v30 = vmul.f32 1.442695, %v1290_v0 }
 0x2fe   : > { %v3334_v11 = vpop.eup %2091 }
 0x2ff   : > { %2097 = vpow2.f32 %v1391_v30  ;;  %1517 = vadd.xlane.f32.xlu1 %v3334_v11 }
 0x300   : > { %v2094_v36 = vpop.eup %2093 }
 0x301   : > { %v1659_v43 = vmul.f32 %v2094_v36, %v3159_v18  ;;  %v1202_v22 = vpop.xlane.xlu2 %1201 }
 0x302   : > { %v2096_v55 = vpop.eup %2095  ;;  %v1554_v61 = vpop.xlane.xlu1 %1553  ;;  %v1291_v26 = vsub.f32 %v3170_v28, %v1202_v22 }
 0x303   : > { %v1690_v50 = vmul.f32 %v2096_v55, %v3162_v31  ;;  %2099 = vrcp.f32 %v1554_v61  ;;  %v1492_v34 = vpop.xlane.xlu0 %1491  ;;  %1723 = vst [vmem:[%s3064_s6 + $0xb0] sm:$0xff] %v1659_v43 }
 0x304   : > { %2101 = vrcp.f32 %v1492_v34  ;;  %v1393_v38 = vmul.f32 1.442695, %v1291_v26 }
 0x305   : > { %v3341_v23 = vpop.eup %2097  ;;  %1754 = vst [vmem:[%s3064_s6 + $0x1a8] sm:$0xff] %v1690_v50 }
 0x306   : > { %1519 = vadd.xlane.f32.xlu2 %v3341_v23  ;;  %2103 = vpow2.f32 %v1393_v38 }
 0x309   : > { %v2100_v18 = vpop.eup %2099  ;;  %v1556_v31 = vpop.xlane.xlu2 %1555 }
 0x30a   : > { %v2102_v47 = vpop.eup %2101  ;;  %v1691_v7 = vmul.f32 %v2100_v18, %v3174_v3  ;;  %v1494_v62 = vpop.xlane.xlu1 %1493  ;;  %2105 = vrcp.f32 %v1556_v31 }
 0x30b   : > { %v1660_v28 = vmul.f32 %v2102_v47, %v3176_v5  ;;  %v1204_v15 = vpop.xlane.xlu0 %1203  ;;  %2107 = vrcp.f32 %v1494_v62 }
 0x30c   : > { %1755 = vst [vmem:[%s3064_s6 + $0x1b0] sm:$0xff] %v1691_v7  ;;  %v1292_v52 = vsub.f32 %v3185_v35, %v1204_v15  ;;  %v3349_v40 = vpop.eup %2103 }
 0x30d   : > { %1724 = vst [vmem:[%s3064_s6 + $0xb8] sm:$0xff] %v1660_v28  ;;  %1521 = vadd.xlane.f32.xlu0 %v3349_v40 }
 0x30e   : > { %v1395_v14 = vmul.f32 1.442695, %v1292_v52 }
 0x310   : > { %2109 = vpow2.f32 %v1395_v14  ;;  %v2106_v3 = vpop.eup %2105 }
 0x311   : > { %v2108_v16 = vpop.eup %2107  ;;  %v1692_v44 = vmul.f32 %v2106_v3, %v3187_v29  ;;  %v1496_v5 = vpop.xlane.xlu2 %1495 }
 0x312   : > { %v1206_v2 = vpop.xlane.xlu1 %1205  ;;  %v1661_v1 = vmul.f32 %v2108_v16, %v3190_v32  ;;  %2111 = vrcp.f32 %v1496_v5 }
 0x313   : > { %v1293_v37 = vsub.f32 %v3199_v8, %v1206_v2  ;;  %v1558_v35 = vpop.xlane.xlu0 %1557  ;;  %1756 = vst [vmem:[%s3064_s6 + $0x1b8] sm:$0xff] %v1692_v44 }
 0x314   : > { %2113 = vrcp.f32 %v1558_v35  ;;  %1725 = vst [vmem:[%s3064_s6 + $0xc0] sm:$0xff] %v1661_v1 }
 0x315   : > { %v1397_v0 = vmul.f32 1.442695, %v1293_v37 }
 0x316   : > { %v3358_v63 = vpop.eup %2109 }
 0x317   : > { %2115 = vpow2.f32 %v1397_v0  ;;  %1523 = vadd.xlane.f32.xlu1 %v3358_v63  ;;  %v1316_v0 = vsub.f32 %v3073_v25, %v3270_v48  ;;  %v1314_v25 = vsub.f32 %v3042_v17, %v3234_v49 }
 0x318   : > { %v2112_v29 = vpop.eup %2111 }
 0x319   : > { %v1662_v36 = vmul.f32 %v2112_v29, %v3203_v6  ;;  %v1208_v32 = vpop.xlane.xlu2 %1207 }
 0x31a   : > { %v2114_v30 = vpop.eup %2113  ;;  %v1560_v55 = vpop.xlane.xlu1 %1559  ;;  %v1294_v43 = vsub.f32 %v3213_v21, %v1208_v32 }
 0x31b   : > { %v1693_v8 = vmul.f32 %v2114_v30, %v3206_v59  ;;  %2117 = vrcp.f32 %v1560_v55  ;;  %v1498_v22 = vpop.xlane.xlu0 %1497  ;;  %1726 = vst [vmem:[%s3064_s6 + $0xc8] sm:$0xff] %v1662_v36 }
 0x31c   : > { %2119 = vrcp.f32 %v1498_v22  ;;  %v1399_v50 = vmul.f32 1.442695, %v1294_v43  ;;  %v1439_v22 = vmul.f32 1.442695, %v1314_v25 }
 0x31d   : > { %v3365_v61 = vpop.eup %2115  ;;  %1757 = vst [vmem:[%s3064_s6 + $0x1c0] sm:$0xff] %v1693_v8 }
 0x31e   : > { %1525 = vadd.xlane.f32.xlu2 %v3365_v61  ;;  %2121 = vpow2.f32 %v1399_v50 }
 0x321   : > { %v2118_v6 = vpop.eup %2117 }
 0x322   : > { %v2120_v26 = vpop.eup %2119  ;;  %v1694_v34 = vmul.f32 %v2118_v6, %v3217_v58  ;;  %v1500_v59 = vpop.xlane.xlu1 %1499 }
 0x323   : > { %v1663_v21 = vmul.f32 %v2120_v26, %v3219_v19  ;;  %2123 = vrcp.f32 %v1500_v59  ;;  %v1210_v38 = vpop.xlane.xlu0 %1209 }
 0x324   : > { %1758 = vst [vmem:[%s3064_s6 + $0x1c8] sm:$0xff] %v1694_v34  ;;  %v1295_v18 = vsub.f32 %v3227_v56, %v1210_v38  ;;  %v3373_v47 = vpop.eup %2121 }
 0x325   : > { %1727 = vst [vmem:[%s3064_s6 + $0xd0] sm:$0xff] %v1663_v21  ;;  %1527 = vadd.xlane.f32.xlu0 %v3373_v47 }
 0x326   : > { %v1401_v7 = vmul.f32 1.442695, %v1295_v18 }
 0x328   : > { %2125 = vpow2.f32 %v1401_v7 }
 0x329   : > { %v2124_v31 = vpop.eup %2123  ;;  %v1502_v62 = vpop.xlane.xlu2 %1501 }
 0x32a   : > { %v1664_v58 = vmul.f32 %v2124_v31, %v3230_v46  ;;  %v1212_v28 = vpop.xlane.xlu1 %1211  ;;  %2127 = vrcp.f32 %v1502_v62 }
 0x32b   : > { %v1296_v19 = vsub.f32 %v3237_v12, %v1212_v28 }
 0x32c   : > { %1728 = vst [vmem:[%s3064_s6 + $0xd8] sm:$0xff] %v1664_v58 }
 0x32d   : > { %v1403_v15 = vmul.f32 1.442695, %v1296_v19 }
 0x32e   : > { %v3380_v52 = vpop.eup %2125 }
 0x32f   : > { %2129 = vpow2.f32 %v1403_v15  ;;  %1529 = vadd.xlane.f32.xlu1 %v3380_v52 }
 0x330   : > { %v2128_v56 = vpop.eup %2127 }
 0x331   : > { %v1665_v14 = vmul.f32 %v2128_v56, %v3241_v4  ;;  %v1214_v3 = vpop.xlane.xlu2 %1213 }
 0x332   : > { %v1297_v16 = vsub.f32 %v3248_v54, %v1214_v3  ;;  %v1504_v46 = vpop.xlane.xlu0 %1503 }
 0x333   : > { %1729 = vst [vmem:[%s3064_s6 + $0xe0] sm:$0xff] %v1665_v14  ;;  %2131 = vrcp.f32 %v1504_v46 }
 0x334   : > { %v1405_v12 = vmul.f32 1.442695, %v1297_v16 }
 0x335   : > { %v3386_v44 = vpop.eup %2129 }
 0x336   : > { %1531 = vadd.xlane.f32.xlu2 %v3386_v44  ;;  %2133 = vpow2.f32 %v1405_v12 }
 0x339   : > { %v2132_v5 = vpop.eup %2131 }
 0x33a   : > { %v1506_v2 = vpop.xlane.xlu1 %1505  ;;  %v1666_v1 = vmul.f32 %v2132_v5, %v3252_v9  ;;  %v1216_v37 = vpop.xlane.xlu0 %1215 }
 0x33b   : > { %2135 = vrcp.f32 %v1506_v2  ;;  %v1298_v4 = vsub.f32 %v3262_v57, %v1216_v37  ;;  %v1443_v57 = vmul.f32 1.442695, %v1316_v0 }
 0x33c   : > { %v3391_v35 = vpop.eup %2133  ;;  %1730 = vst [vmem:[%s3064_s6 + $0xe8] sm:$0xff] %v1666_v1 }
 0x33d   : > { %v1407_v54 = vmul.f32 1.442695, %v1298_v4  ;;  %1533 = vadd.xlane.f32.xlu0 %v3391_v35 }
 0x33f   : > { %2137 = vpow2.f32 %v1407_v54 }
 0x341   : > { %v2136_v29 = vpop.eup %2135  ;;  %v1508_v36 = vpop.xlane.xlu2 %1507 }
 0x342   : > { %v1667_v30 = vmul.f32 %v2136_v29, %v3265_v60  ;;  %v1218_v9 = vpop.xlane.xlu1 %1217  ;;  %2139 = vrcp.f32 %v1508_v36  ;;  %v1564_v55 = vpop.xlane.xlu0 %1563 }
 0x343   : > { %v1299_v32 = vsub.f32 %v3273_v42, %v1218_v9  ;;  %2141 = vrcp.f32 %v1564_v55 }
 0x344   : > { %1731 = vst [vmem:[%s3064_s6 + $0xf0] sm:$0xff] %v1667_v30 }
 0x345   : > { %v1409_v8 = vmul.f32 1.442695, %v1299_v32  ;;  %v3400_v43 = vpop.eup %2137 }
 0x346   : > { %1535 = vadd.xlane.f32.xlu1 %v3400_v43 }
 0x347   : > { %2143 = vpow2.f32 %v1409_v8 }
 0x348   : > { %2145 = vpow2.f32 %v1443_v57  ;;  %v2140_v60 = vpop.eup %2139 }
 0x349   : > { %v2142_v48 = vpop.eup %2141  ;;  %v1668_v42 = vmul.f32 %v2140_v60, %v3275_v13  ;;  %v1220_v50 = vpop.xlane.xlu2 %1219  ;;  %v1315_v13 = vsub.f32 %v3055_v53, %v3257_v41 }
 0x34a   : > { %v1566_v6 = vpop.xlane.xlu1 %1565  ;;  %v1696_v26 = vmul.f32 %v2142_v48, %v3277_v33  ;;  %v1300_v34 = vsub.f32 %v3288_v24, %v1220_v50 }
 0x34b   : > { %2147 = vrcp.f32 %v1566_v6  ;;  %1732 = vst [vmem:[%s3064_s6 + $0xf8] sm:$0xff] %v1668_v42  ;;  %v1441_v18 = vmul.f32 1.442695, %v1315_v13 }
 0x34c   : > { %1760 = vst [vmem:[%s3064_s6 + $0x1d8] sm:$0xff] %v1696_v26  ;;  %v1411_v17 = vmul.f32 1.442695, %v1300_v34  ;;  %2149 = vpow2.f32 %v1439_v22 }
 0x34d   : > { %v3409_v59 = vpop.eup %2143 }
 0x34e   : > { %v3412_v49 = vpop.eup %2145  ;;  %1537 = vadd.xlane.f32.xlu2 %v3409_v59  ;;  %2151 = vpow2.f32 %v1411_v17 }
 0x34f   : > { %1571 = vadd.xlane.f32.xlu1 %v3412_v49 }
 0x350   : > { %v1510_v24 = vpop.xlane.xlu0 %1509 }
 0x351   : > { %v2148_v33 = vpop.eup %2147  ;;  %2153 = vrcp.f32 %v1510_v24  ;;  %v1562_v38 = vpop.xlane.xlu2 %1561 }
 0x352   : > { %v1697_v21 = vmul.f32 %v2148_v33, %v3292_v20  ;;  %2155 = vrcp.f32 %v1562_v38  ;;  %v3419_v7 = vpop.eup %2149 }
 0x353   : > { %2157 = vpow2.f32 %v1441_v18 }
 0x354   : > { %1761 = vst [vmem:[%s3064_s6 + $0x1e0] sm:$0xff] %v1697_v21  ;;  %v3422_v31 = vpop.eup %2151 }
 0x355   : > { %1539 = vadd.xlane.f32.xlu0 %v3422_v31 }
 0x356   : > { %1567 = vadd.xlane.f32.xlu2 %v3419_v7 }
 0x357   : > { %v2154_v53 = vpop.eup %2153 }
 0x358   : > { %v2156_v41 = vpop.eup %2155  ;;  %v1669_v20 = vmul.f32 %v2154_v53, %v3298_v39 }
 0x359   : > { %v1695_v58 = vmul.f32 %v2156_v41, %v3301_v10  ;;  %v1512_v62 = vpop.xlane.xlu1 %1511  ;;  %v3430_v28 = vpop.eup %2157 }
 0x35a   : > { %1733 = vst [vmem:[%s3064_s6 + $0x100] sm:$0xff] %v1669_v20  ;;  %2159 = vrcp.f32 %v1512_v62 }
 0x35b   : > { %1759 = vst [vmem:[%s3064_s6 + $0x1d0] sm:$0xff] %v1695_v58 }
 0x35d   : > { %1569 = vadd.xlane.f32.xlu0 %v3430_v28 }
 0x360   : > { %v2160_v19 = vpop.eup %2159 }
 0x361   : > { %v1514_v15 = vpop.xlane.xlu2 %1513  ;;  %v1670_v56 = vmul.f32 %v2160_v19, %v3310_v45 }
 0x362   : > { %2161 = vrcp.f32 %v1514_v15 }
 0x363   : > { %1734 = vst [vmem:[%s3064_s6 + $0x108] sm:$0xff] %v1670_v56 }
 0x368   : > { %v2162_v39 = vpop.eup %2161  ;;  %v1516_v14 = vpop.xlane.xlu0 %1515 }
 0x369   : > { %v1671_v10 = vmul.f32 %v2162_v39, %v3317_v27  ;;  %2163 = vrcp.f32 %v1516_v14 }
 0x36b   : > { %1735 = vst [vmem:[%s3064_s6 + $0x110] sm:$0xff] %v1671_v10 }
 0x36f   : > { %v2164_v3 = vpop.eup %2163 }
 0x370   : > { %v1672_v16 = vmul.f32 %v2164_v3, %v3325_v51 }
 0x372   : > { %v1518_v46 = vpop.xlane.xlu1 %1517  ;;  %1736 = vst [vmem:[%s3064_s6 + $0x118] sm:$0xff] %v1672_v16 }
 0x373   : > { %2165 = vrcp.f32 %v1518_v46 }
 0x379   : > { %v2166_v12 = vpop.eup %2165  ;;  %v1520_v5 = vpop.xlane.xlu2 %1519 }
 0x37a   : > { %v1673_v45 = vmul.f32 %v2166_v12, %v3334_v11  ;;  %2167 = vrcp.f32 %v1520_v5 }
 0x37c   : > { %1737 = vst [vmem:[%s3064_s6 + $0x120] sm:$0xff] %v1673_v45 }
 0x380   : > { %v2168_v2 = vpop.eup %2167  ;;  %v1522_v1 = vpop.xlane.xlu0 %1521 }
 0x381   : > { %v1674_v27 = vmul.f32 %v2168_v2, %v3341_v23  ;;  %2169 = vrcp.f32 %v1522_v1 }
 0x383   : > { %1738 = vst [vmem:[%s3064_s6 + $0x128] sm:$0xff] %v1674_v27 }
 0x387   : > { %v2170_v37 = vpop.eup %2169 }
 0x388   : > { %v1675_v51 = vmul.f32 %v2170_v37, %v3349_v40 }
 0x38a   : > { %v1524_v4 = vpop.xlane.xlu1 %1523  ;;  %1739 = vst [vmem:[%s3064_s6 + $0x130] sm:$0xff] %v1675_v51 }
 0x38b   : > { %2171 = vrcp.f32 %v1524_v4 }
 0x391   : > { %v2172_v54 = vpop.eup %2171  ;;  %v1526_v0 = vpop.xlane.xlu2 %1525 }
 0x392   : > { %v1676_v11 = vmul.f32 %v2172_v54, %v3358_v63  ;;  %2173 = vrcp.f32 %v1526_v0 }
 0x394   : > { %1740 = vst [vmem:[%s3064_s6 + $0x138] sm:$0xff] %v1676_v11 }
 0x398   : > { %v2174_v29 = vpop.eup %2173  ;;  %v1528_v30 = vpop.xlane.xlu0 %1527 }
 0x399   : > { %v1677_v23 = vmul.f32 %v2174_v29, %v3365_v61  ;;  %2175 = vrcp.f32 %v1528_v30 }
 0x39b   : > { %1741 = vst [vmem:[%s3064_s6 + $0x140] sm:$0xff] %v1677_v23 }
 0x39f   : > { %v2176_v36 = vpop.eup %2175 }
 0x3a0   : > { %v1678_v40 = vmul.f32 %v2176_v36, %v3373_v47 }
 0x3a2   : > { %v1530_v9 = vpop.xlane.xlu1 %1529  ;;  %1742 = vst [vmem:[%s3064_s6 + $0x148] sm:$0xff] %v1678_v40 }
 0x3a3   : > { %2177 = vrcp.f32 %v1530_v9 }
 0x3a9   : > { %v2178_v32 = vpop.eup %2177  ;;  %v1532_v55 = vpop.xlane.xlu2 %1531 }
 0x3aa   : > { %v1679_v63 = vmul.f32 %v2178_v32, %v3380_v52  ;;  %2179 = vrcp.f32 %v1532_v55 }
 0x3ac   : > { %1743 = vst [vmem:[%s3064_s6 + $0x150] sm:$0xff] %v1679_v63 }
 0x3b0   : > { %v2180_v57 = vpop.eup %2179  ;;  %v1534_v8 = vpop.xlane.xlu0 %1533 }
 0x3b1   : > { %v1680_v61 = vmul.f32 %v2180_v57, %v3386_v44  ;;  %2181 = vrcp.f32 %v1534_v8 }
 0x3b3   : > { %1744 = vst [vmem:[%s3064_s6 + $0x158] sm:$0xff] %v1680_v61 }
 0x3b7   : > { %v2182_v25 = vpop.eup %2181 }
 0x3b8   : > { %v1681_v47 = vmul.f32 %v2182_v25, %v3391_v35 }
 0x3b9   : > { %v1536_v60 = vpop.xlane.xlu1 %1535 }
 0x3ba   : > { %1745 = vst [vmem:[%s3064_s6 + $0x160] sm:$0xff] %v1681_v47  ;;  %2183 = vrcp.f32 %v1536_v60 }
 0x3c0   : > { %v2184_v48 = vpop.eup %2183 }
 0x3c1   : > { %v1538_v22 = vpop.xlane.xlu2 %1537  ;;  %v1682_v52 = vmul.f32 %v2184_v48, %v3400_v43 }
 0x3c2   : > { %2185 = vrcp.f32 %v1538_v22  ;;  %v1572_v42 = vpop.xlane.xlu1 %1571 }
 0x3c3   : > { %2187 = vrcp.f32 %v1572_v42  ;;  %1746 = vst [vmem:[%s3064_s6 + $0x168] sm:$0xff] %v1682_v52 }
 0x3c8   : > { %v2186_v44 = vpop.eup %2185  ;;  %v1540_v26 = vpop.xlane.xlu0 %1539 }
 0x3c9   : > { %v2188_v50 = vpop.eup %2187  ;;  %v1683_v6 = vmul.f32 %v2186_v44, %v3409_v59  ;;  %v1568_v35 = vpop.xlane.xlu2 %1567 }
 0x3ca   : > { %v1700_v34 = vmul.f32 %v2188_v50, %v3412_v49  ;;  %2189 = vrcp.f32 %v1568_v35 }
 0x3cb   : > { %1747 = vst [vmem:[%s3064_s6 + $0x170] sm:$0xff] %v1683_v6  ;;  %2191 = vrcp.f32 %v1540_v26 }
 0x3cc   : > { %1764 = vst [vmem:[%s3064_s6 + $0x1f8] sm:$0xff] %v1700_v34 }
 0x3d0   : > { %v2190_v43 = vpop.eup %2189  ;;  %v1570_v33 = vpop.xlane.xlu0 %1569 }
 0x3d1   : > { %v2192_v17 = vpop.eup %2191  ;;  %v1698_v13 = vmul.f32 %v2190_v43, %v3419_v7  ;;  %2193 = vrcp.f32 %v1570_v33 }
 0x3d2   : > { %v1684_v24 = vmul.f32 %v2192_v17, %v3422_v31 }
 0x3d3   : > { %1762 = vst [vmem:[%s3064_s6 + $0x1e8] sm:$0xff] %v1698_v13 }
 0x3d4   : > { %1748 = vst [vmem:[%s3064_s6 + $0x178] sm:$0xff] %v1684_v24 }
 0x3d7   : > { %v2194_v59 = vpop.eup %2193 }
 0x3d8   : > { %v1699_v21 = vmul.f32 %v2194_v59, %v3430_v28 }
 0x3da   : > { %1763 = vst [vmem:[%s3064_s6 + $0x1f0] sm:$0xff] %v1699_v21 }
 0x3db PF: > { %p15_p7 = scmp.ge.s32.totalorder %s2315_s23, 4   ;;  %s3491_s18 = smov %s2253_s19 }
 0x3dc   : > { %s3492_s19 = smov %s2257_s20  ;;  %s3493_s20 = smov %s2325_s26 }
 0x3dd   : > { %s3494_s21 = smov %s2315_s23  ;;  %17 = sbr.rel (!%p15_p7) target bundleno = 3 (0x3), region = 80 }
 0x3e2   :  { %1787 = vsyncpa [#allocation3], 1 }
 0x3e3   :  { %1789 = vsyncpa [#allocation3 + $0x1], 1 }

</bundles_post_ra>
